<compile_context>
chip_gen: v7x
topology: tpu7x:2x2x1
jax: 0.10.0
libtpu: 0.0.40
codegen_flags: <defaults>
</compile_context>

<pallas_src>
import math
import functools

import jax
import jax.numpy as jnp
from jax import lax
from jax.experimental import pallas as pl
from jax.experimental.pallas import tpu as pltpu  # noqa: F401  (TPU backend import)


_INV_SQRT2 = 1.0 / math.sqrt(2.0)


def _gelu_exact(x):
    # Exact (erf) GELU, matching torch.nn.functional.gelu default.
    return 0.5 * x * (1.0 + lax.erf(x * _INV_SQRT2))


def _attend_ff(Qp, Kp, Vp, wo, bo, *, num_heads):
    """Per-head softmax attention + residual, then row-wise GELU FF with residual.

    Qp: (B, nq, dim_V)  projected queries (unscaled; the score scale is folded into Kp)
    Kp: (B, nk, dim_V)  projected keys, already scaled by 1/sqrt(dim_V)
    Vp: (B, nk, dim_V)  projected values
    Returns (B, nq, dim_V).
    """
    B, nq, dim_V = Qp.shape
    ds = dim_V // num_heads

    head_outs = []
    for h in range(num_heads):                       # static unroll; static lane slices
        lo = h * ds
        qh = Qp[:, :, lo:lo + ds]                    # (B, nq, ds)
        kh = Kp[:, :, lo:lo + ds]                    # (B, nk, ds)
        vh = Vp[:, :, lo:lo + ds]                    # (B, nk, ds)
        # Batched over the whole batch, contracting the last dims directly.
        s = jnp.einsum('bqd,bkd->bqk', qh, kh, preferred_element_type=jnp.float32)
        m = jnp.max(s, axis=-1, keepdims=True)
        p = jnp.exp(s - m)
        inv_l = pl.reciprocal(jnp.sum(p, axis=-1, keepdims=True), approx=True)
        av = jnp.einsum('bqk,bkd->bqd', p * inv_l, vh, preferred_element_type=jnp.float32)
        head_outs.append(qh + av)                    # residual on the projected Q

    # Reassemble heads with one lane-dim concat (stays in vregs).
    O = jnp.concatenate(head_outs, axis=-1)          # (B, nq, dim_V)

    # Row-wise feed-forward with residual: O + gelu(O Wo + bo).
    O2 = O.reshape(B * nq, dim_V)
    ff = jnp.dot(O2, wo, preferred_element_type=jnp.float32) + bo
    return (O2 + _gelu_exact(ff)).reshape(B, nq, dim_V)


def _isab_kernel(x_ref, i_ref,
                 wq0_ref, bq0_ref, wx_ref, bx_ref, wo0_ref, bo0_ref,
                 wkv1_ref, bkv1_ref, wo1_ref, bo1_ref,
                 o_ref, *, num_heads):
    X = x_ref[...]                                   # (B, N, dim_in)
    I = i_ref[...]                                   # (num_inds, dim_V)
    B, N, dim_in = X.shape
    num_inds, dim_V = I.shape

    # ---- One packed projection of X: [K0(scaled) | V0 | Q1] in a single matmul. ----
    XP = (jnp.dot(X.reshape(B * N, dim_in), wx_ref[...],
                  preferred_element_type=jnp.float32) + bx_ref[...]).reshape(B, N, 3 * dim_V)
    Kp0 = XP[:, :, :dim_V]
    Vp0 = XP[:, :, dim_V:2 * dim_V]
    Qp1 = XP[:, :, 2 * dim_V:]

    # ---- MAB0: H = MAB(I, X).  I is batch-independent: project once, broadcast. ----
    Qp0 = jnp.dot(I, wq0_ref[...], preferred_element_type=jnp.float32) + bq0_ref[...]
    Qp0 = jnp.broadcast_to(Qp0[None], (B, num_inds, dim_V))
    H = _attend_ff(Qp0, Kp0, Vp0, wo0_ref[...], bo0_ref[...], num_heads=num_heads)

    # ---- MAB1: out = MAB(X, H).  Packed K|V projection of H (K pre-scaled). ----
    HP = (jnp.dot(H.reshape(B * num_inds, dim_V), wkv1_ref[...],
                  preferred_element_type=jnp.float32) + bkv1_ref[...]).reshape(B, num_inds, 2 * dim_V)
    Kp1 = HP[:, :, :dim_V]
    Vp1 = HP[:, :, dim_V:]
    o_ref[...] = _attend_ff(Qp1, Kp1, Vp1, wo1_ref[...], bo1_ref[...], num_heads=num_heads)


def isab_forward(X, params, num_heads):
    """ISAB(X) = MAB(X, MAB(I, X)), fused into one Pallas kernel.  X: (B, N, dim_in)."""
    wq0, bq0, wk0, bk0, wv0, bv0, wo0, bo0 = params["mab0"]
    wq1, bq1, wk1, bk1, wv1, bv1, wo1, bo1 = params["mab1"]
    I = params["I"][0]                               # (num_inds, dim_out)
    dim_V = wq0.shape[1]
    assert dim_V % num_heads == 0
    scale = 1.0 / math.sqrt(dim_V)                   # module scales by sqrt(dim_V), not sqrt(head_dim)

    # Fold the softmax score scale into the K projections (softmax-equivalent) and pack:
    #   X-consumed projections  -> one (dim_in, 3*dim_V) weight  [K0*s | V0 | Q1]
    #   H-consumed projections  -> one (dim_V, 2*dim_V) weight   [K1*s | V1]
    # These are tiny constant-shaped host-side ops done once per call (constant-fold under jit).
    wx = jnp.concatenate([wk0 * scale, wv0, wq1], axis=1)       # (dim_in, 3*dim_V)
    bx = jnp.concatenate([bk0 * scale, bv0, bq1], axis=1)       # (1, 3*dim_V)
    wkv1 = jnp.concatenate([wk1 * scale, wv1], axis=1)          # (dim_V, 2*dim_V)
    bkv1 = jnp.concatenate([bk1 * scale, bv1], axis=1)          # (1, 2*dim_V)

    B, N, _ = X.shape
    kernel = functools.partial(_isab_kernel, num_heads=num_heads)

    # Grid-less call: whole batch + both MABs in one step.  Every operand (activations
    # and all weights for both MABs) easily fits VMEM at these sizes, so there is no
    # per-batch grid loop, no second kernel launch, and no HBM round-trip for H.
    return pl.pallas_call(
        kernel,
        out_shape=jax.ShapeDtypeStruct((B, N, dim_V), jnp.float32),
    )(X, I, wq0, bq0, wx, bx, wo0, bo0, wkv1, bkv1, wo1, bo1)


# ---------------- parameter construction (deterministic, in-script) ----------------

def _init_linear(key, d_in, d_out):
    """nn.Linear-style init. W returned already transposed to (d_in, d_out), bias (1, d_out)."""
    k1, k2 = jax.random.split(key)
    bound = 1.0 / math.sqrt(d_in)
    w = jax.random.uniform(k1, (d_out, d_in), jnp.float32, -bound, bound)
    b = jax.random.uniform(k2, (d_out,), jnp.float32, -bound, bound)
    return w.T, b.reshape(1, d_out)


def _init_mab(key, dim_Q, dim_K, dim_V):
    ks = jax.random.split(key, 4)
    wq, bq = _init_linear(ks[0], dim_Q, dim_V)
    wk, bk = _init_linear(ks[1], dim_K, dim_V)
    wv, bv = _init_linear(ks[2], dim_K, dim_V)
    wo, bo = _init_linear(ks[3], dim_V, dim_V)
    return (wq, bq, wk, bk, wv, bv, wo, bo)


def init_isab_params(key, dim_in, dim_out, num_inds):
    k_i, k0, k1 = jax.random.split(key, 3)
    # xavier_uniform_ on I of shape (1, num_inds, dim_out)
    bound = math.sqrt(6.0 / (num_inds + dim_out))
    I = jax.random.uniform(k_i, (1, num_inds, dim_out), jnp.float32, -bound, bound)
    mab0 = _init_mab(k0, dim_out, dim_in, dim_out)   # MAB(I, X)
    mab1 = _init_mab(k1, dim_in, dim_out, dim_out)   # MAB(X, H)
    return {"I": I, "mab0": mab0, "mab1": mab1}


# ---------------- pure-JAX reference (mirrors the PyTorch module) ----------------

def _mab_reference(Q, K, params, num_heads):
    wq, bq, wk, bk, wv, bv, wo, bo = params
    dim_V = wq.shape[1]
    ds = dim_V // num_heads
    Qp = jnp.einsum('bnd,de->bne', Q, wq) + bq
    Kp = jnp.einsum('bnd,de->bne', K, wk) + bk
    Vp = jnp.einsum('bnd,de->bne', K, wv) + bv
    outs = []
    for h in range(num_heads):
        sl = slice(h * ds, (h + 1) * ds)
        s = jnp.einsum('bqd,bkd->bqk', Qp[..., sl], Kp[..., sl]) / math.sqrt(dim_V)
        a = jax.nn.softmax(s, axis=-1)
        outs.append(Qp[..., sl] + jnp.einsum('bqk,bkd->bqd', a, Vp[..., sl]))
    O = jnp.concatenate(outs, axis=-1)
    ff = jnp.einsum('bnd,de->bne', O, wo) + bo
    return O + jax.nn.gelu(ff, approximate=False)


def isab_reference(X, params, num_heads):
    B = X.shape[0]
    I_rep = jnp.broadcast_to(params["I"], (B,) + params["I"].shape[1:])
    H = _mab_reference(I_rep, X, params["mab0"], num_heads)
    return _mab_reference(X, H, params["mab1"], num_heads)


if __name__ == "__main__":
    # Small, module-consistent shapes.
    B, N = 2, 16
    dim_in, dim_out = 8, 32
    num_heads, num_inds = 4, 8

    key = jax.random.PRNGKey(0)
    kx, kp = jax.random.split(key)
    X = jax.random.normal(kx, (B, N, dim_in), jnp.float32)
    params = init_isab_params(kp, dim_in, dim_out, num_inds)

    out = jax.block_until_ready(isab_forward(X, params, num_heads))
    assert out.shape == (B, N, dim_out)
    assert bool(jnp.all(jnp.isfinite(out)))

    ref = jax.block_until_ready(isab_reference(X, params, num_heads))
    max_err = float(jnp.max(jnp.abs(out - ref)))
    assert max_err < 2e-3, f"kernel/reference mismatch, max abs err = {max_err}"

    print("KERNEL_OK")
</pallas_src>

<mosaic_0001>
module attributes {stable_mosaic.version = 11 : i64} {
  func.func @_isab_kernel(%arg0: memref<2x16x8xf32, #tpu.memory_space<vmem>>, %arg1: memref<8x32xf32, #tpu.memory_space<vmem>>, %arg2: memref<32x32xf32, #tpu.memory_space<vmem>>, %arg3: memref<1x32xf32, #tpu.memory_space<vmem>>, %arg4: memref<8x96xf32, #tpu.memory_space<vmem>>, %arg5: memref<1x96xf32, #tpu.memory_space<vmem>>, %arg6: memref<32x32xf32, #tpu.memory_space<vmem>>, %arg7: memref<1x32xf32, #tpu.memory_space<vmem>>, %arg8: memref<32x64xf32, #tpu.memory_space<vmem>>, %arg9: memref<1x64xf32, #tpu.memory_space<vmem>>, %arg10: memref<32x32xf32, #tpu.memory_space<vmem>>, %arg11: memref<1x32xf32, #tpu.memory_space<vmem>>, %arg12: memref<2x16x32xf32, #tpu.memory_space<vmem>>) attributes {dimension_semantics = [], scalar_prefetch = 0 : i64, scratch_operands = 0 : i64, tpu.core_type = #tpu.core_type<tc>} {
    %c0 = arith.constant 0 : index
    %c0_0 = arith.constant 0 : index
    %c0_1 = arith.constant 0 : index
    %0 = vector.load %arg0[%c0, %c0_0, %c0_1] : memref<2x16x8xf32, #tpu.memory_space<vmem>>, vector<2x16x8xf32>
    %c0_2 = arith.constant 0 : index
    %c0_3 = arith.constant 0 : index
    %1 = vector.load %arg1[%c0_2, %c0_3] : memref<8x32xf32, #tpu.memory_space<vmem>>, vector<8x32xf32>
    %2 = vector.shape_cast %0 : vector<2x16x8xf32> to vector<32x8xf32>
    %c0_4 = arith.constant 0 : index
    %c0_5 = arith.constant 0 : index
    %3 = vector.load %arg4[%c0_4, %c0_5] : memref<8x96xf32, #tpu.memory_space<vmem>>, vector<8x96xf32>
    %cst = arith.constant dense<0.000000e+00> : vector<32x96xf32>
    %4 = tpu.matmul %2, %3, %cst {dimension_numbers = #tpu.dot_dimension_numbers<[1], [0], [0], [1], [0, 0, 1, 1], [], []>} : vector<32x8xf32>, vector<8x96xf32>, vector<32x96xf32> -> vector<32x96xf32>
    %c0_6 = arith.constant 0 : index
    %c0_7 = arith.constant 0 : index
    %5 = vector.load %arg5[%c0_6, %c0_7] : memref<1x96xf32, #tpu.memory_space<vmem>>, vector<1x96xf32>
    %6 = vector.broadcast %5 : vector<1x96xf32> to vector<32x96xf32>
    %7 = arith.addf %4, %6 : vector<32x96xf32>
    %8 = vector.shape_cast %7 : vector<32x96xf32> to vector<2x16x96xf32>
    %9 = vector.extract_strided_slice %8 {offsets = [0, 0, 0], sizes = [2, 16, 32], strides = [1, 1, 1]} : vector<2x16x96xf32> to vector<2x16x32xf32>
    %10 = vector.extract_strided_slice %8 {offsets = [0, 0, 32], sizes = [2, 16, 32], strides = [1, 1, 1]} : vector<2x16x96xf32> to vector<2x16x32xf32>
    %11 = vector.extract_strided_slice %8 {offsets = [0, 0, 64], sizes = [2, 16, 32], strides = [1, 1, 1]} : vector<2x16x96xf32> to vector<2x16x32xf32>
    %c0_8 = arith.constant 0 : index
    %c0_9 = arith.constant 0 : index
    %12 = vector.load %arg2[%c0_8, %c0_9] : memref<32x32xf32, #tpu.memory_space<vmem>>, vector<32x32xf32>
    %cst_10 = arith.constant dense<0.000000e+00> : vector<8x32xf32>
    %13 = tpu.matmul %1, %12, %cst_10 {dimension_numbers = #tpu.dot_dimension_numbers<[1], [0], [0], [1], [0, 0, 1, 1], [], []>} : vector<8x32xf32>, vector<32x32xf32>, vector<8x32xf32> -> vector<8x32xf32>
    %c0_11 = arith.constant 0 : index
    %c0_12 = arith.constant 0 : index
    %14 = vector.load %arg3[%c0_11, %c0_12] : memref<1x32xf32, #tpu.memory_space<vmem>>, vector<1x32xf32>
    %15 = vector.broadcast %14 : vector<1x32xf32> to vector<8x32xf32>
    %16 = arith.addf %13, %15 : vector<8x32xf32>
    %17 = vector.shape_cast %16 : vector<8x32xf32> to vector<1x8x32xf32>
    %18 = vector.shape_cast %17 : vector<1x8x32xf32> to vector<1x8x32xf32>
    %19 = vector.broadcast %18 : vector<1x8x32xf32> to vector<2x8x32xf32>
    %c0_13 = arith.constant 0 : index
    %c0_14 = arith.constant 0 : index
    %20 = vector.load %arg6[%c0_13, %c0_14] : memref<32x32xf32, #tpu.memory_space<vmem>>, vector<32x32xf32>
    %c0_15 = arith.constant 0 : index
    %c0_16 = arith.constant 0 : index
    %21 = vector.load %arg7[%c0_15, %c0_16] : memref<1x32xf32, #tpu.memory_space<vmem>>, vector<1x32xf32>
    %22 = vector.extract_strided_slice %19 {offsets = [0, 0, 0], sizes = [2, 8, 8], strides = [1, 1, 1]} : vector<2x8x32xf32> to vector<2x8x8xf32>
    %23 = vector.extract_strided_slice %9 {offsets = [0, 0, 0], sizes = [2, 16, 8], strides = [1, 1, 1]} : vector<2x16x32xf32> to vector<2x16x8xf32>
    %24 = vector.extract_strided_slice %10 {offsets = [0, 0, 0], sizes = [2, 16, 8], strides = [1, 1, 1]} : vector<2x16x32xf32> to vector<2x16x8xf32>
    "tpu.trace_start"() <{level = 10 : i32, message = "bqd,bkd->bqk"}> : () -> ()
    %cst_17 = arith.constant dense<0.000000e+00> : vector<2x8x16xf32>
    %25 = tpu.matmul %22, %23, %cst_17 {dimension_numbers = #tpu.dot_dimension_numbers<[2], [2], [1], [1], [0, 0, 0, 1, 1, 1], [0], [0]>} : vector<2x8x8xf32>, vector<2x16x8xf32>, vector<2x8x16xf32> -> vector<2x8x16xf32>
    "tpu.trace_stop"() : () -> ()
    %cst_18 = arith.constant dense<0xFF800000> : vector<2x8xf32>
    %26 = vector.multi_reduction <maximumf>, %25, %cst_18 [2] : vector<2x8x16xf32> to vector<2x8xf32>
    %27 = vector.shape_cast %26 : vector<2x8xf32> to vector<2x8x1xf32>
    %28 = vector.broadcast %27 : vector<2x8x1xf32> to vector<2x8x16xf32>
    %29 = arith.subf %25, %28 : vector<2x8x16xf32>
    %30 = math.exp %29 : vector<2x8x16xf32>
    %cst_19 = arith.constant dense<0.000000e+00> : vector<2x8xf32>
    %31 = vector.multi_reduction <add>, %30, %cst_19 [2] : vector<2x8x16xf32> to vector<2x8xf32>
    %32 = vector.shape_cast %31 : vector<2x8xf32> to vector<2x8x1xf32>
    %33 = tpu.reciprocal %32 {approx = true} : vector<2x8x1xf32> -> vector<2x8x1xf32>
    %34 = vector.broadcast %33 : vector<2x8x1xf32> to vector<2x8x16xf32>
    %35 = arith.mulf %30, %34 : vector<2x8x16xf32>
    "tpu.trace_start"() <{level = 10 : i32, message = "bqk,bkd->bqd"}> : () -> ()
    %cst_20 = arith.constant dense<0.000000e+00> : vector<2x8x8xf32>
    %36 = tpu.matmul %35, %24, %cst_20 {dimension_numbers = #tpu.dot_dimension_numbers<[2], [1], [1], [2], [0, 0, 0, 1, 1, 2], [0], [0]>} : vector<2x8x16xf32>, vector<2x16x8xf32>, vector<2x8x8xf32> -> vector<2x8x8xf32>
    "tpu.trace_stop"() : () -> ()
    %37 = arith.addf %22, %36 : vector<2x8x8xf32>
    %38 = vector.extract_strided_slice %19 {offsets = [0, 0, 8], sizes = [2, 8, 8], strides = [1, 1, 1]} : vector<2x8x32xf32> to vector<2x8x8xf32>
    %39 = vector.extract_strided_slice %9 {offsets = [0, 0, 8], sizes = [2, 16, 8], strides = [1, 1, 1]} : vector<2x16x32xf32> to vector<2x16x8xf32>
    %40 = vector.extract_strided_slice %10 {offsets = [0, 0, 8], sizes = [2, 16, 8], strides = [1, 1, 1]} : vector<2x16x32xf32> to vector<2x16x8xf32>
    "tpu.trace_start"() <{level = 10 : i32, message = "bqd,bkd->bqk"}> : () -> ()
    %cst_21 = arith.constant dense<0.000000e+00> : vector<2x8x16xf32>
    %41 = tpu.matmul %38, %39, %cst_21 {dimension_numbers = #tpu.dot_dimension_numbers<[2], [2], [1], [1], [0, 0, 0, 1, 1, 1], [0], [0]>} : vector<2x8x8xf32>, vector<2x16x8xf32>, vector<2x8x16xf32> -> vector<2x8x16xf32>
    "tpu.trace_stop"() : () -> ()
    %cst_22 = arith.constant dense<0xFF800000> : vector<2x8xf32>
    %42 = vector.multi_reduction <maximumf>, %41, %cst_22 [2] : vector<2x8x16xf32> to vector<2x8xf32>
    %43 = vector.shape_cast %42 : vector<2x8xf32> to vector<2x8x1xf32>
    %44 = vector.broadcast %43 : vector<2x8x1xf32> to vector<2x8x16xf32>
    %45 = arith.subf %41, %44 : vector<2x8x16xf32>
    %46 = math.exp %45 : vector<2x8x16xf32>
    %cst_23 = arith.constant dense<0.000000e+00> : vector<2x8xf32>
    %47 = vector.multi_reduction <add>, %46, %cst_23 [2] : vector<2x8x16xf32> to vector<2x8xf32>
    %48 = vector.shape_cast %47 : vector<2x8xf32> to vector<2x8x1xf32>
    %49 = tpu.reciprocal %48 {approx = true} : vector<2x8x1xf32> -> vector<2x8x1xf32>
    %50 = vector.broadcast %49 : vector<2x8x1xf32> to vector<2x8x16xf32>
    %51 = arith.mulf %46, %50 : vector<2x8x16xf32>
    "tpu.trace_start"() <{level = 10 : i32, message = "bqk,bkd->bqd"}> : () -> ()
    %cst_24 = arith.constant dense<0.000000e+00> : vector<2x8x8xf32>
    %52 = tpu.matmul %51, %40, %cst_24 {dimension_numbers = #tpu.dot_dimension_numbers<[2], [1], [1], [2], [0, 0, 0, 1, 1, 2], [0], [0]>} : vector<2x8x16xf32>, vector<2x16x8xf32>, vector<2x8x8xf32> -> vector<2x8x8xf32>
    "tpu.trace_stop"() : () -> ()
    %53 = arith.addf %38, %52 : vector<2x8x8xf32>
    %54 = vector.extract_strided_slice %19 {offsets = [0, 0, 16], sizes = [2, 8, 8], strides = [1, 1, 1]} : vector<2x8x32xf32> to vector<2x8x8xf32>
    %55 = vector.extract_strided_slice %9 {offsets = [0, 0, 16], sizes = [2, 16, 8], strides = [1, 1, 1]} : vector<2x16x32xf32> to vector<2x16x8xf32>
    %56 = vector.extract_strided_slice %10 {offsets = [0, 0, 16], sizes = [2, 16, 8], strides = [1, 1, 1]} : vector<2x16x32xf32> to vector<2x16x8xf32>
    "tpu.trace_start"() <{level = 10 : i32, message = "bqd,bkd->bqk"}> : () -> ()
    %cst_25 = arith.constant dense<0.000000e+00> : vector<2x8x16xf32>
    %57 = tpu.matmul %54, %55, %cst_25 {dimension_numbers = #tpu.dot_dimension_numbers<[2], [2], [1], [1], [0, 0, 0, 1, 1, 1], [0], [0]>} : vector<2x8x8xf32>, vector<2x16x8xf32>, vector<2x8x16xf32> -> vector<2x8x16xf32>
    "tpu.trace_stop"() : () -> ()
    %cst_26 = arith.constant dense<0xFF800000> : vector<2x8xf32>
    %58 = vector.multi_reduction <maximumf>, %57, %cst_26 [2] : vector<2x8x16xf32> to vector<2x8xf32>
    %59 = vector.shape_cast %58 : vector<2x8xf32> to vector<2x8x1xf32>
    %60 = vector.broadcast %59 : vector<2x8x1xf32> to vector<2x8x16xf32>
    %61 = arith.subf %57, %60 : vector<2x8x16xf32>
    %62 = math.exp %61 : vector<2x8x16xf32>
    %cst_27 = arith.constant dense<0.000000e+00> : vector<2x8xf32>
    %63 = vector.multi_reduction <add>, %62, %cst_27 [2] : vector<2x8x16xf32> to vector<2x8xf32>
    %64 = vector.shape_cast %63 : vector<2x8xf32> to vector<2x8x1xf32>
    %65 = tpu.reciprocal %64 {approx = true} : vector<2x8x1xf32> -> vector<2x8x1xf32>
    %66 = vector.broadcast %65 : vector<2x8x1xf32> to vector<2x8x16xf32>
    %67 = arith.mulf %62, %66 : vector<2x8x16xf32>
    "tpu.trace_start"() <{level = 10 : i32, message = "bqk,bkd->bqd"}> : () -> ()
    %cst_28 = arith.constant dense<0.000000e+00> : vector<2x8x8xf32>
    %68 = tpu.matmul %67, %56, %cst_28 {dimension_numbers = #tpu.dot_dimension_numbers<[2], [1], [1], [2], [0, 0, 0, 1, 1, 2], [0], [0]>} : vector<2x8x16xf32>, vector<2x16x8xf32>, vector<2x8x8xf32> -> vector<2x8x8xf32>
    "tpu.trace_stop"() : () -> ()
    %69 = arith.addf %54, %68 : vector<2x8x8xf32>
    %70 = vector.extract_strided_slice %19 {offsets = [0, 0, 24], sizes = [2, 8, 8], strides = [1, 1, 1]} : vector<2x8x32xf32> to vector<2x8x8xf32>
    %71 = vector.extract_strided_slice %9 {offsets = [0, 0, 24], sizes = [2, 16, 8], strides = [1, 1, 1]} : vector<2x16x32xf32> to vector<2x16x8xf32>
    %72 = vector.extract_strided_slice %10 {offsets = [0, 0, 24], sizes = [2, 16, 8], strides = [1, 1, 1]} : vector<2x16x32xf32> to vector<2x16x8xf32>
    "tpu.trace_start"() <{level = 10 : i32, message = "bqd,bkd->bqk"}> : () -> ()
    %cst_29 = arith.constant dense<0.000000e+00> : vector<2x8x16xf32>
    %73 = tpu.matmul %70, %71, %cst_29 {dimension_numbers = #tpu.dot_dimension_numbers<[2], [2], [1], [1], [0, 0, 0, 1, 1, 1], [0], [0]>} : vector<2x8x8xf32>, vector<2x16x8xf32>, vector<2x8x16xf32> -> vector<2x8x16xf32>
    "tpu.trace_stop"() : () -> ()
    %cst_30 = arith.constant dense<0xFF800000> : vector<2x8xf32>
    %74 = vector.multi_reduction <maximumf>, %73, %cst_30 [2] : vector<2x8x16xf32> to vector<2x8xf32>
    %75 = vector.shape_cast %74 : vector<2x8xf32> to vector<2x8x1xf32>
    %76 = vector.broadcast %75 : vector<2x8x1xf32> to vector<2x8x16xf32>
    %77 = arith.subf %73, %76 : vector<2x8x16xf32>
    %78 = math.exp %77 : vector<2x8x16xf32>
    %cst_31 = arith.constant dense<0.000000e+00> : vector<2x8xf32>
    %79 = vector.multi_reduction <add>, %78, %cst_31 [2] : vector<2x8x16xf32> to vector<2x8xf32>
    %80 = vector.shape_cast %79 : vector<2x8xf32> to vector<2x8x1xf32>
    %81 = tpu.reciprocal %80 {approx = true} : vector<2x8x1xf32> -> vector<2x8x1xf32>
    %82 = vector.broadcast %81 : vector<2x8x1xf32> to vector<2x8x16xf32>
    %83 = arith.mulf %78, %82 : vector<2x8x16xf32>
    "tpu.trace_start"() <{level = 10 : i32, message = "bqk,bkd->bqd"}> : () -> ()
    %cst_32 = arith.constant dense<0.000000e+00> : vector<2x8x8xf32>
    %84 = tpu.matmul %83, %72, %cst_32 {dimension_numbers = #tpu.dot_dimension_numbers<[2], [1], [1], [2], [0, 0, 0, 1, 1, 2], [0], [0]>} : vector<2x8x16xf32>, vector<2x16x8xf32>, vector<2x8x8xf32> -> vector<2x8x8xf32>
    "tpu.trace_stop"() : () -> ()
    %85 = arith.addf %70, %84 : vector<2x8x8xf32>
    %86 = tpu.concatenate %37, %53, %69, %85 in 2 : vector<2x8x8xf32>, vector<2x8x8xf32>, vector<2x8x8xf32>, vector<2x8x8xf32> -> vector<2x8x32xf32>
    %87 = vector.shape_cast %86 : vector<2x8x32xf32> to vector<16x32xf32>
    %cst_33 = arith.constant dense<0.000000e+00> : vector<16x32xf32>
    %88 = tpu.matmul %87, %20, %cst_33 {dimension_numbers = #tpu.dot_dimension_numbers<[1], [0], [0], [1], [0, 0, 1, 1], [], []>} : vector<16x32xf32>, vector<32x32xf32>, vector<16x32xf32> -> vector<16x32xf32>
    %89 = vector.broadcast %21 : vector<1x32xf32> to vector<16x32xf32>
    %90 = arith.addf %88, %89 : vector<16x32xf32>
    %cst_34 = arith.constant 5.000000e-01 : f32
    %91 = vector.broadcast %cst_34 : f32 to vector<16x32xf32>
    %92 = arith.mulf %91, %90 : vector<16x32xf32>
    %cst_35 = arith.constant 0.707106769 : f32
    %93 = vector.broadcast %cst_35 : f32 to vector<16x32xf32>
    %94 = arith.mulf %90, %93 : vector<16x32xf32>
    %95 = math.erf %94 : vector<16x32xf32>
    %cst_36 = arith.constant 1.000000e+00 : f32
    %96 = vector.broadcast %cst_36 : f32 to vector<16x32xf32>
    %97 = arith.addf %96, %95 : vector<16x32xf32>
    %98 = arith.mulf %92, %97 : vector<16x32xf32>
    %99 = arith.addf %87, %98 : vector<16x32xf32>
    %100 = vector.shape_cast %99 : vector<16x32xf32> to vector<2x8x32xf32>
    %101 = vector.shape_cast %100 : vector<2x8x32xf32> to vector<16x32xf32>
    %c0_37 = arith.constant 0 : index
    %c0_38 = arith.constant 0 : index
    %102 = vector.load %arg8[%c0_37, %c0_38] : memref<32x64xf32, #tpu.memory_space<vmem>>, vector<32x64xf32>
    %cst_39 = arith.constant dense<0.000000e+00> : vector<16x64xf32>
    %103 = tpu.matmul %101, %102, %cst_39 {dimension_numbers = #tpu.dot_dimension_numbers<[1], [0], [0], [1], [0, 0, 1, 1], [], []>} : vector<16x32xf32>, vector<32x64xf32>, vector<16x64xf32> -> vector<16x64xf32>
    %c0_40 = arith.constant 0 : index
    %c0_41 = arith.constant 0 : index
    %104 = vector.load %arg9[%c0_40, %c0_41] : memref<1x64xf32, #tpu.memory_space<vmem>>, vector<1x64xf32>
    %105 = vector.broadcast %104 : vector<1x64xf32> to vector<16x64xf32>
    %106 = arith.addf %103, %105 : vector<16x64xf32>
    %107 = vector.shape_cast %106 : vector<16x64xf32> to vector<2x8x64xf32>
    %108 = vector.extract_strided_slice %107 {offsets = [0, 0, 0], sizes = [2, 8, 32], strides = [1, 1, 1]} : vector<2x8x64xf32> to vector<2x8x32xf32>
    %109 = vector.extract_strided_slice %107 {offsets = [0, 0, 32], sizes = [2, 8, 32], strides = [1, 1, 1]} : vector<2x8x64xf32> to vector<2x8x32xf32>
    %c0_42 = arith.constant 0 : index
    %c0_43 = arith.constant 0 : index
    %110 = vector.load %arg10[%c0_42, %c0_43] : memref<32x32xf32, #tpu.memory_space<vmem>>, vector<32x32xf32>
    %c0_44 = arith.constant 0 : index
    %c0_45 = arith.constant 0 : index
    %111 = vector.load %arg11[%c0_44, %c0_45] : memref<1x32xf32, #tpu.memory_space<vmem>>, vector<1x32xf32>
    %112 = vector.extract_strided_slice %11 {offsets = [0, 0, 0], sizes = [2, 16, 8], strides = [1, 1, 1]} : vector<2x16x32xf32> to vector<2x16x8xf32>
    %113 = vector.extract_strided_slice %108 {offsets = [0, 0, 0], sizes = [2, 8, 8], strides = [1, 1, 1]} : vector<2x8x32xf32> to vector<2x8x8xf32>
    %114 = vector.extract_strided_slice %109 {offsets = [0, 0, 0], sizes = [2, 8, 8], strides = [1, 1, 1]} : vector<2x8x32xf32> to vector<2x8x8xf32>
    "tpu.trace_start"() <{level = 10 : i32, message = "bqd,bkd->bqk"}> : () -> ()
    %cst_46 = arith.constant dense<0.000000e+00> : vector<2x16x8xf32>
    %115 = tpu.matmul %112, %113, %cst_46 {dimension_numbers = #tpu.dot_dimension_numbers<[2], [2], [1], [1], [0, 0, 0, 1, 1, 1], [0], [0]>} : vector<2x16x8xf32>, vector<2x8x8xf32>, vector<2x16x8xf32> -> vector<2x16x8xf32>
    "tpu.trace_stop"() : () -> ()
    %cst_47 = arith.constant dense<0xFF800000> : vector<2x16xf32>
    %116 = vector.multi_reduction <maximumf>, %115, %cst_47 [2] : vector<2x16x8xf32> to vector<2x16xf32>
    %117 = vector.shape_cast %116 : vector<2x16xf32> to vector<2x16x1xf32>
    %118 = vector.broadcast %117 : vector<2x16x1xf32> to vector<2x16x8xf32>
    %119 = arith.subf %115, %118 : vector<2x16x8xf32>
    %120 = math.exp %119 : vector<2x16x8xf32>
    %cst_48 = arith.constant dense<0.000000e+00> : vector<2x16xf32>
    %121 = vector.multi_reduction <add>, %120, %cst_48 [2] : vector<2x16x8xf32> to vector<2x16xf32>
    %122 = vector.shape_cast %121 : vector<2x16xf32> to vector<2x16x1xf32>
    %123 = tpu.reciprocal %122 {approx = true} : vector<2x16x1xf32> -> vector<2x16x1xf32>
    %124 = vector.broadcast %123 : vector<2x16x1xf32> to vector<2x16x8xf32>
    %125 = arith.mulf %120, %124 : vector<2x16x8xf32>
    "tpu.trace_start"() <{level = 10 : i32, message = "bqk,bkd->bqd"}> : () -> ()
    %cst_49 = arith.constant dense<0.000000e+00> : vector<2x16x8xf32>
    %126 = tpu.matmul %125, %114, %cst_49 {dimension_numbers = #tpu.dot_dimension_numbers<[2], [1], [1], [2], [0, 0, 0, 1, 1, 2], [0], [0]>} : vector<2x16x8xf32>, vector<2x8x8xf32>, vector<2x16x8xf32> -> vector<2x16x8xf32>
    "tpu.trace_stop"() : () -> ()
    %127 = arith.addf %112, %126 : vector<2x16x8xf32>
    %128 = vector.extract_strided_slice %11 {offsets = [0, 0, 8], sizes = [2, 16, 8], strides = [1, 1, 1]} : vector<2x16x32xf32> to vector<2x16x8xf32>
    %129 = vector.extract_strided_slice %108 {offsets = [0, 0, 8], sizes = [2, 8, 8], strides = [1, 1, 1]} : vector<2x8x32xf32> to vector<2x8x8xf32>
    %130 = vector.extract_strided_slice %109 {offsets = [0, 0, 8], sizes = [2, 8, 8], strides = [1, 1, 1]} : vector<2x8x32xf32> to vector<2x8x8xf32>
    "tpu.trace_start"() <{level = 10 : i32, message = "bqd,bkd->bqk"}> : () -> ()
    %cst_50 = arith.constant dense<0.000000e+00> : vector<2x16x8xf32>
    %131 = tpu.matmul %128, %129, %cst_50 {dimension_numbers = #tpu.dot_dimension_numbers<[2], [2], [1], [1], [0, 0, 0, 1, 1, 1], [0], [0]>} : vector<2x16x8xf32>, vector<2x8x8xf32>, vector<2x16x8xf32> -> vector<2x16x8xf32>
    "tpu.trace_stop"() : () -> ()
    %cst_51 = arith.constant dense<0xFF800000> : vector<2x16xf32>
    %132 = vector.multi_reduction <maximumf>, %131, %cst_51 [2] : vector<2x16x8xf32> to vector<2x16xf32>
    %133 = vector.shape_cast %132 : vector<2x16xf32> to vector<2x16x1xf32>
    %134 = vector.broadcast %133 : vector<2x16x1xf32> to vector<2x16x8xf32>
    %135 = arith.subf %131, %134 : vector<2x16x8xf32>
    %136 = math.exp %135 : vector<2x16x8xf32>
    %cst_52 = arith.constant dense<0.000000e+00> : vector<2x16xf32>
    %137 = vector.multi_reduction <add>, %136, %cst_52 [2] : vector<2x16x8xf32> to vector<2x16xf32>
    %138 = vector.shape_cast %137 : vector<2x16xf32> to vector<2x16x1xf32>
    %139 = tpu.reciprocal %138 {approx = true} : vector<2x16x1xf32> -> vector<2x16x1xf32>
    %140 = vector.broadcast %139 : vector<2x16x1xf32> to vector<2x16x8xf32>
    %141 = arith.mulf %136, %140 : vector<2x16x8xf32>
    "tpu.trace_start"() <{level = 10 : i32, message = "bqk,bkd->bqd"}> : () -> ()
    %cst_53 = arith.constant dense<0.000000e+00> : vector<2x16x8xf32>
    %142 = tpu.matmul %141, %130, %cst_53 {dimension_numbers = #tpu.dot_dimension_numbers<[2], [1], [1], [2], [0, 0, 0, 1, 1, 2], [0], [0]>} : vector<2x16x8xf32>, vector<2x8x8xf32>, vector<2x16x8xf32> -> vector<2x16x8xf32>
    "tpu.trace_stop"() : () -> ()
    %143 = arith.addf %128, %142 : vector<2x16x8xf32>
    %144 = vector.extract_strided_slice %11 {offsets = [0, 0, 16], sizes = [2, 16, 8], strides = [1, 1, 1]} : vector<2x16x32xf32> to vector<2x16x8xf32>
    %145 = vector.extract_strided_slice %108 {offsets = [0, 0, 16], sizes = [2, 8, 8], strides = [1, 1, 1]} : vector<2x8x32xf32> to vector<2x8x8xf32>
    %146 = vector.extract_strided_slice %109 {offsets = [0, 0, 16], sizes = [2, 8, 8], strides = [1, 1, 1]} : vector<2x8x32xf32> to vector<2x8x8xf32>
    "tpu.trace_start"() <{level = 10 : i32, message = "bqd,bkd->bqk"}> : () -> ()
    %cst_54 = arith.constant dense<0.000000e+00> : vector<2x16x8xf32>
    %147 = tpu.matmul %144, %145, %cst_54 {dimension_numbers = #tpu.dot_dimension_numbers<[2], [2], [1], [1], [0, 0, 0, 1, 1, 1], [0], [0]>} : vector<2x16x8xf32>, vector<2x8x8xf32>, vector<2x16x8xf32> -> vector<2x16x8xf32>
    "tpu.trace_stop"() : () -> ()
    %cst_55 = arith.constant dense<0xFF800000> : vector<2x16xf32>
    %148 = vector.multi_reduction <maximumf>, %147, %cst_55 [2] : vector<2x16x8xf32> to vector<2x16xf32>
    %149 = vector.shape_cast %148 : vector<2x16xf32> to vector<2x16x1xf32>
    %150 = vector.broadcast %149 : vector<2x16x1xf32> to vector<2x16x8xf32>
    %151 = arith.subf %147, %150 : vector<2x16x8xf32>
    %152 = math.exp %151 : vector<2x16x8xf32>
    %cst_56 = arith.constant dense<0.000000e+00> : vector<2x16xf32>
    %153 = vector.multi_reduction <add>, %152, %cst_56 [2] : vector<2x16x8xf32> to vector<2x16xf32>
    %154 = vector.shape_cast %153 : vector<2x16xf32> to vector<2x16x1xf32>
    %155 = tpu.reciprocal %154 {approx = true} : vector<2x16x1xf32> -> vector<2x16x1xf32>
    %156 = vector.broadcast %155 : vector<2x16x1xf32> to vector<2x16x8xf32>
    %157 = arith.mulf %152, %156 : vector<2x16x8xf32>
    "tpu.trace_start"() <{level = 10 : i32, message = "bqk,bkd->bqd"}> : () -> ()
    %cst_57 = arith.constant dense<0.000000e+00> : vector<2x16x8xf32>
    %158 = tpu.matmul %157, %146, %cst_57 {dimension_numbers = #tpu.dot_dimension_numbers<[2], [1], [1], [2], [0, 0, 0, 1, 1, 2], [0], [0]>} : vector<2x16x8xf32>, vector<2x8x8xf32>, vector<2x16x8xf32> -> vector<2x16x8xf32>
    "tpu.trace_stop"() : () -> ()
    %159 = arith.addf %144, %158 : vector<2x16x8xf32>
    %160 = vector.extract_strided_slice %11 {offsets = [0, 0, 24], sizes = [2, 16, 8], strides = [1, 1, 1]} : vector<2x16x32xf32> to vector<2x16x8xf32>
    %161 = vector.extract_strided_slice %108 {offsets = [0, 0, 24], sizes = [2, 8, 8], strides = [1, 1, 1]} : vector<2x8x32xf32> to vector<2x8x8xf32>
    %162 = vector.extract_strided_slice %109 {offsets = [0, 0, 24], sizes = [2, 8, 8], strides = [1, 1, 1]} : vector<2x8x32xf32> to vector<2x8x8xf32>
    "tpu.trace_start"() <{level = 10 : i32, message = "bqd,bkd->bqk"}> : () -> ()
    %cst_58 = arith.constant dense<0.000000e+00> : vector<2x16x8xf32>
    %163 = tpu.matmul %160, %161, %cst_58 {dimension_numbers = #tpu.dot_dimension_numbers<[2], [2], [1], [1], [0, 0, 0, 1, 1, 1], [0], [0]>} : vector<2x16x8xf32>, vector<2x8x8xf32>, vector<2x16x8xf32> -> vector<2x16x8xf32>
    "tpu.trace_stop"() : () -> ()
    %cst_59 = arith.constant dense<0xFF800000> : vector<2x16xf32>
    %164 = vector.multi_reduction <maximumf>, %163, %cst_59 [2] : vector<2x16x8xf32> to vector<2x16xf32>
    %165 = vector.shape_cast %164 : vector<2x16xf32> to vector<2x16x1xf32>
    %166 = vector.broadcast %165 : vector<2x16x1xf32> to vector<2x16x8xf32>
    %167 = arith.subf %163, %166 : vector<2x16x8xf32>
    %168 = math.exp %167 : vector<2x16x8xf32>
    %cst_60 = arith.constant dense<0.000000e+00> : vector<2x16xf32>
    %169 = vector.multi_reduction <add>, %168, %cst_60 [2] : vector<2x16x8xf32> to vector<2x16xf32>
    %170 = vector.shape_cast %169 : vector<2x16xf32> to vector<2x16x1xf32>
    %171 = tpu.reciprocal %170 {approx = true} : vector<2x16x1xf32> -> vector<2x16x1xf32>
    %172 = vector.broadcast %171 : vector<2x16x1xf32> to vector<2x16x8xf32>
    %173 = arith.mulf %168, %172 : vector<2x16x8xf32>
    "tpu.trace_start"() <{level = 10 : i32, message = "bqk,bkd->bqd"}> : () -> ()
    %cst_61 = arith.constant dense<0.000000e+00> : vector<2x16x8xf32>
    %174 = tpu.matmul %173, %162, %cst_61 {dimension_numbers = #tpu.dot_dimension_numbers<[2], [1], [1], [2], [0, 0, 0, 1, 1, 2], [0], [0]>} : vector<2x16x8xf32>, vector<2x8x8xf32>, vector<2x16x8xf32> -> vector<2x16x8xf32>
    "tpu.trace_stop"() : () -> ()
    %175 = arith.addf %160, %174 : vector<2x16x8xf32>
    %176 = tpu.concatenate %127, %143, %159, %175 in 2 : vector<2x16x8xf32>, vector<2x16x8xf32>, vector<2x16x8xf32>, vector<2x16x8xf32> -> vector<2x16x32xf32>
    %177 = vector.shape_cast %176 : vector<2x16x32xf32> to vector<32x32xf32>
    %cst_62 = arith.constant dense<0.000000e+00> : vector<32x32xf32>
    %178 = tpu.matmul %177, %110, %cst_62 {dimension_numbers = #tpu.dot_dimension_numbers<[1], [0], [0], [1], [0, 0, 1, 1], [], []>} : vector<32x32xf32>, vector<32x32xf32>, vector<32x32xf32> -> vector<32x32xf32>
    %179 = vector.broadcast %111 : vector<1x32xf32> to vector<32x32xf32>
    %180 = arith.addf %178, %179 : vector<32x32xf32>
    %cst_63 = arith.constant 5.000000e-01 : f32
    %181 = vector.broadcast %cst_63 : f32 to vector<32x32xf32>
    %182 = arith.mulf %181, %180 : vector<32x32xf32>
    %cst_64 = arith.constant 0.707106769 : f32
    %183 = vector.broadcast %cst_64 : f32 to vector<32x32xf32>
    %184 = arith.mulf %180, %183 : vector<32x32xf32>
    %185 = math.erf %184 : vector<32x32xf32>
    %cst_65 = arith.constant 1.000000e+00 : f32
    %186 = vector.broadcast %cst_65 : f32 to vector<32x32xf32>
    %187 = arith.addf %186, %185 : vector<32x32xf32>
    %188 = arith.mulf %182, %187 : vector<32x32xf32>
    %189 = arith.addf %177, %188 : vector<32x32xf32>
    %190 = vector.shape_cast %189 : vector<32x32xf32> to vector<2x16x32xf32>
    %c0_66 = arith.constant 0 : index
    %c0_67 = arith.constant 0 : index
    %c0_68 = arith.constant 0 : index
    %191 = vector.load %arg12[%c0_66, %c0_67, %c0_68] : memref<2x16x32xf32, #tpu.memory_space<vmem>>, vector<2x16x32xf32>
    tpu.vector_store %arg12[%c0_66, %c0_67, %c0_68], %190 {strides = array<i32>} : memref<2x16x32xf32, #tpu.memory_space<vmem>>, vector<2x16x32xf32>,
    return
  }
}

</mosaic_0001>

<bundles_post_ra>
// kernel: tpu_custom_call.1
= control target key start
LH: loop header
LB: loop body
LE: loop exit
PB: predicated region body
PF: predicated region fallthrough
CT: control target
= control target key end

     0   :  { %17 = vsyncpa [#allocation3], 0  ;;  %s5250_s0 = inlined_call_operand.vmem [shape: f32[2,16,8], index: 0, kind: input, shape index: {}]   ;;  %s5251_s1 = inlined_call_operand.hbm [shape: f32[8,32], index: 1, kind: input, shape index: {}]   ;;  %s5252_s2 = inlined_call_operand.vmem [shape: f32[32,32], index: 2, kind: input, shape index: {}]   ;;  %s5253_s3 = inlined_call_operand.vmem [shape: f32[1,32], index: 3, kind: input, shape index: {}]   ;;  %s5254_s4 = inlined_call_operand.hbm [shape: f32[8,96], index: 4, kind: input, shape index: {}]   ;;  %s5255_s5 = inlined_call_operand.vmem [shape: f32[1,96], index: 5, kind: input, shape index: {}]   ;;  %s5256_s6 = inlined_call_operand.vmem [shape: f32[32,32], index: 6, kind: input, shape index: {}]   ;;  %s5257_s7 = inlined_call_operand.vmem [shape: f32[1,32], index: 7, kind: input, shape index: {}]   ;;  %s5258_s8 = inlined_call_operand.hbm [shape: f32[32,64], index: 8, kind: input, shape index: {}]   ;;  %s5259_s9 = inlined_call_operand.vmem [shape: f32[1,64], index: 9, kind: input, shape index: {}]   ;;  %s5260_s10 = inlined_call_operand.hbm [shape: f32[32,32], index: 10, kind: input, shape index: {}]   ;;  %s5261_s11 = inlined_call_operand.vmem [shape: f32[1,32], index: 11, kind: input, shape index: {}]   ;;  %s5262_s12 = inlined_call_operand.hbm [shape: f32[2,16,32], index: 12, kind: output, shape index: {}]  }
   0x1   :  { %18 = vsyncpa [#allocation6], 0 }
   0x2   :  { %19 = vsyncpa [#allocation9], 0 }
   0x3   :  { %20 = vsyncpa [#allocation4], 0  ;;  %s4601_s21 = smov [#allocation5]   ;;  %s4602_s23 = smov [#allocation2]  }
   0x4   :  { %s43_s22 = sshll.u32 %s4601_s21, 4  ;;  %s29_s24 = sshll.u32 %s4602_s23, 4  ;;  %s44_s22 = int_to_ptr.vmem [resolvable:$true] %s43_s22  ;;  %s30_s24 = int_to_ptr.vmem [resolvable:$true] %s29_s24 }
   0x5   :  { %s4483_s27 = scalar_lea.hbm %s5254_s4, 128 }
   0x6   :  { %p4484_p0 = scmp.ne.s32.totalorder %s5254_s4, %s4483_s27  ;;  %p4487_p1 = scmp.lt.u32.totalorder %s4483_s27, %s5254_s4 }
   0x8   :  { %p4489_p2 = pnand %p4487_p1, %p4484_p0 }
   0xa   :  { %4492 = shalt.err (!%p4489_p2)
}
   0xb   :  { %s4493_s14 = scalar_lea.vmem %s44_s22, 128  ;;  %p4498_p4 = scmp.lt.s32.totalorder %s44_s22, %s44_s22 }
   0xc   :  { %p4494_p3 = scmp.ne.s32.totalorder %s44_s22, %s4493_s14  ;;  %p4499_p5 = scmp.lt.s32.totalorder %s4493_s14, %s4493_s14 }
   0xe   :  { %p4500_p6 = por %p4499_p5, %p4498_p4 }
  0x10   :  { %p4501_p7 = pnand %p4500_p6, %p4494_p3 }
  0x12   :  { %4504 = shalt.err (!%p4501_p7)
}
  0x13   :  { %46 = dma.hbm_to_vmem [thread:$0]  %s5254_s4, 128, %s44_s22, [#allocation6]  }
  0x14   :  { %s4505_s19 = scalar_lea.hbm %s5251_s1, 128 }
  0x15   :  { %p4506_p8 = scmp.ne.s32.totalorder %s5251_s1, %s4505_s19  ;;  %p4509_p9 = scmp.lt.u32.totalorder %s4505_s19, %s5251_s1 }
  0x17   :  { %p4511_p10 = pnand %p4509_p9, %p4506_p8 }
  0x19   :  { %4514 = shalt.err (!%p4511_p10)
}
  0x1a   :  { %s4515_s26 = scalar_lea.vmem %s30_s24, 128  ;;  %p4520_p12 = scmp.lt.s32.totalorder %s30_s24, %s30_s24 }
  0x1b   :  { %p4516_p11 = scmp.ne.s32.totalorder %s30_s24, %s4515_s26  ;;  %p4521_p13 = scmp.lt.s32.totalorder %s4515_s26, %s4515_s26 }
  0x1d   :  { %p4522_p0 = por %p4521_p13, %p4520_p12 }
  0x1f   :  { %p4523_p1 = pnand %p4522_p0, %p4516_p11 }
  0x21   :  { %4526 = shalt.err (!%p4523_p1)
}
  0x22   :  { %32 = dma.hbm_to_vmem [thread:$0]  %s5251_s1, 128, %s30_s24, [#allocation3]  }
  0x23   :  { %s4603_s27 = smov [#allocation7]   ;;  %s4527_s13 = scalar_lea.hbm %s5258_s8, 512 }
  0x24   :  { %s58_s28 = sshll.u32 %s4603_s27, 4  ;;  %p4528_p2 = scmp.ne.s32.totalorder %s5258_s8, %s4527_s13  ;;  %s59_s28 = int_to_ptr.vmem [resolvable:$true] %s58_s28 }
  0x25   :  { %p4531_p3 = scmp.lt.u32.totalorder %s4527_s13, %s5258_s8 }
  0x27   :  { %p4533_p4 = pnand %p4531_p3, %p4528_p2 }
  0x29   :  { %4536 = shalt.err (!%p4533_p4)
}
  0x2a   :  { %s4537_s18 = scalar_lea.vmem %s59_s28, 512  ;;  %p4542_p6 = scmp.lt.s32.totalorder %s59_s28, %s59_s28 }
  0x2b   :  { %p4538_p5 = scmp.ne.s32.totalorder %s59_s28, %s4537_s18  ;;  %p4543_p7 = scmp.lt.s32.totalorder %s4537_s18, %s4537_s18 }
  0x2d   :  { %p4544_p8 = por %p4543_p7, %p4542_p6 }
  0x2f   :  { %p4545_p9 = pnand %p4544_p8, %p4538_p5 }
  0x31   :  { %4548 = shalt.err (!%p4545_p9)
}
  0x32   :  { %s4604_s1 = smov 128   ;;  %s4605_s24 = smov 8  }
  0x33   :  { %64 = dma.hbm_to_vmem [thread:$0]  %s5258_s8, 512, %s59_s28, [#allocation6], %s4604_s1, %s4604_s1, %s4605_s24  }
  0x34   :  { %s4606_s21 = smov [#allocation8]   ;;  %s4549_s4 = scalar_lea.hbm %s5260_s10, 512 }
  0x35   :  { %s72_s23 = sshll.u32 %s4606_s21, 4  ;;  %p4550_p10 = scmp.ne.s32.totalorder %s5260_s10, %s4549_s4  ;;  %s73_s23 = int_to_ptr.vmem [resolvable:$true] %s72_s23 }
  0x36   :  { %p4553_p11 = scmp.lt.u32.totalorder %s4549_s4, %s5260_s10 }
  0x38   :  { %p4555_p12 = pnand %p4553_p11, %p4550_p10 }
  0x3a   :  { %4558 = shalt.err (!%p4555_p12)
}
  0x3b   :  { %s4559_s13 = scalar_lea.vmem %s73_s23, 512  ;;  %p4564_p0 = scmp.lt.s32.totalorder %s73_s23, %s73_s23 }
  0x3c   :  { %p4560_p13 = scmp.ne.s32.totalorder %s73_s23, %s4559_s13  ;;  %p4565_p1 = scmp.lt.s32.totalorder %s4559_s13, %s4559_s13 }
  0x3e   :  { %p4566_p2 = por %p4565_p1, %p4564_p0 }
  0x40   :  { %p4567_p3 = pnand %p4566_p2, %p4560_p13 }
  0x42   :  { %4570 = shalt.err (!%p4567_p3)
}
  0x43   :  { %78 = dma.hbm_to_vmem [thread:$0]  %s5260_s10, 512, %s73_s23, [#allocation9], %s4604_s1, %s4604_s1, %s4605_s24  }
  0x44   :  { %4593 = dma.done.wait [#allocation3], 128  }
  0x45   :  { %4594 = vsyncadd [#allocation3], 4294967168 }
  0x46   :  { %4595 = dma.done.wait [#allocation6], 640  }
  0x47   :  { %4596 = vsyncadd [#allocation6], 4294966656 }
  0x48   :  { %4597 = dma.done.wait [#allocation9], 512  }
  0x49   :  { %4598 = vsyncadd [#allocation9], 4294966784  ;;  %v4607_v0 = vmov 0.0|0.0   ;;  %vm4608_vm0 = vmmov 0   ;;  %v4609_v1 = vmov 0.0   ;;  %vm106_vm1 = vcmask 64512  }
  0x4a   :  { %4196 = vmatprep.subr.bf16.mxu1 %v4607_v0  ;;  %3965 = vmatprep.mubr.msk.f32.mxu1 %vm4608_vm0, %v4609_v1  ;;  %v98_v2 = vld [vmem:[#allocation5] sm:$0xff]  ;;  %v93_v3 = vld [vmem:[%s5250_s0] sm:$0xff]  ;;  %v95_v7 = vld [vmem:[%s5250_s0 + $0x10] sm:$0xff]  ;;  %vm215_vm2 = vcmask 261120   ;;  %s4610_s13 = smov 96   ;;  %vm449_vm4 = vcmask 130048  }
  0x4b   :  { %v94_v4 = vld [vmem:[%s5250_s0 + $0x8] sm:$0xff]  ;;  %3949 = vmatprep.subr.mxu0 %v98_v2  ;;  %3951 = vmatprep.mubr.msk.f32.mxu0 %vm106_vm1, %v93_v3  ;;  %v204_v5 = vld [vmem:[%s5252_s2] sm:$0xff]  ;;  %v206_v9 = vld [vmem:[%s5252_s2 + $0x10] sm:$0xff]  ;;  %s4612_s8 = smov 88   ;;  %s4613_s28 = smov 112   ;;  %vm1686_vm5 = vcmask 195584  }
  0x4c   :  { %v205_v6 = vld [vmem:[%s5252_s2 + $0x8] sm:$0xff]  ;;  %3950 = vmatpush3.msra.mxu0 %v98_v2  ;;  %v207_v10 = vld [vmem:[%s5252_s2 + $0x18] sm:$0xff]  ;;  %v97_v13 = vld [vmem:[#allocation2] sm:$0xff]  ;;  %s4614_s14 = smov 80   ;;  %s4615_s15 = smov 104  }
  0x4d   :  { %v4197_v8 = vpack.c.bf16 %v205_v6, %v204_v5  ;;  %3952 = vmatmul.mubr.msk.f32.vlgmr.msra.gmra.mrb[0].mxu0 %vm106_vm1, %v94_v4  ;;  %4202 = vmatprep.subr.bf16.mxu0 %v4607_v0  ;;  %v96_v11 = vld [vmem:[%s5250_s0 + $0x18] sm:$0xff]  ;;  %v4200_v12 = vpack.c.bf16 %v207_v10, %v206_v9  ;;  %v3733_v14 = vld [vmem:[%s5255_s5] ss:$0 sm:$0xff]  ;;  %vm4791_vm3 = vmpackc.low %vm106_vm1, %vm106_vm1  ;;  %s4616_s10 = smov 72   ;;  %s4617_s16 = smov 16  }
  0x4e   :  { %3954 = vmatprep.mubr.msk.f32.mxu0 %vm106_vm1, %v95_v7  ;;  %v3738_v25 = vld [vmem:[%s5253_s3] ss:$0 sm:$0xff]  ;;  %s4611_s3 = smov 120   ;;  %s4618_s4 = smov 24  }
  0x4f   :  { %4198 = vmatpush3.bf16.msra.mxu1 %v4197_v8  ;;  %s4619_s22 = smov 64   ;;  %s4621_s2 = smov 48  }
  0x50   :  { %4199 = vmatprep.subr.bf16.mxu1 %v4607_v0  ;;  %s4622_s0 = smov 40  }
  0x51   :  { %3955 = vmatmul.mubr.msk.f32.gmra.mrb[2].mxu0 %vm106_vm1, %v96_v11 }
  0x52   :  { %3972 = vmatprep.mubr.msk.f32.mxu0 %vm4608_vm0, %v4609_v1 }
  0x53   :  { %4201 = vmatpush3.bf16.msra.mxu1 %v4200_v12 }
  0x54   :  { %4206 = vmatprep.subr.bf16.mxu1 %v4607_v0 }
  0x56   :  { %3966 = vmatmul.mubr.msk.f32.vlgmr.msra.gmra.mrb[0].mxu1 %vm215_vm2, %v97_v13 }
  0x57   :  { %3979 = vmatprep.mubr.msk.f32.mxu1 %vm4608_vm0, %v4609_v1 }
 0x120   :  { %v3953_v15 = vpop.f32.mrb[0].mxu0 }
 0x121   :  { %v4785_v16 = vadd.f32 %v3953_v15, %v3733_v14  ;;  %v185_v17 = vpop.f32.mrb[1].mxu0 }
 0x122   :  { %v4787_v18 = vadd.f32 %v3733_v14, %v185_v17 }
 0x124   :  { %v3956_v20 = vpop.f32.mrb[2].mxu0  ;;  %v4203_v21 = vpack.c.bf16 %v4785_v16, %v4787_v18  ;;  %v4822_v31 = vpack.i.bf16 %v4785_v16, %v4787_v18 }
 0x125   :  { %v4797_v22 = vadd.f32 %v3956_v20, %v3733_v14  ;;  %v195_v23 = vpop.f32.mrb[3].mxu0 }
 0x126   :  { %v4799_v24 = vadd.f32 %v3733_v14, %v195_v23  ;;  %4205 = vmatpush3.bf16.xpose.msk.msra.mxu0 %vm4791_vm3, %v4203_v21 }
 0x127   :  { %4210 = vmatprep.subr.bf16.mxu0 %v4607_v0 }
 0x128   :  { %v4809_v27 = vpack.i.bf16 %v4797_v22, %v4799_v24  ;;  %v4207_v28 = vpack.c.bf16 %v4797_v22, %v4799_v24 }
 0x129   :  { %v285_v26 = vpop.f32.mrb[0].mxu1 }
 0x12a   :  { %v4813_v29 = vadd.f32 %v3738_v25, %v285_v26  ;;  %v3967_v30 = vpop.f32.mrb[1].mxu1  ;;  %4311 = vrot.lane.b32.xlu1 %v4809_v27, %s4610_s13  ;;  %4209 = vmatpush3.bf16.xpose.msk.msra.mxu1 %vm4791_vm3, %v4207_v28 }
 0x12b   :  { %4216 = vmatprep.subr.bf16.mxu1 %v4607_v0 }
 0x12d   :  { %3973 = vmatmul.mubr.msk.f32.vlgmr.msra.gmra.mrb[4].mxu0 %vm106_vm1, %v4813_v29 }
 0x12e   :  { %4316 = vrot.lane.b32.xlu1 %v4822_v31, %s4611_s3  ;;  %3986 = vmatprep.mubr.msk.f32.mxu0 %vm4608_vm0, %v4609_v1 }
 0x131   :  { %3980 = vmatmul.mubr.msk.f32.vlgmr.msra.gmra.mrb[2].mxu1 %vm106_vm1, %v4813_v29 }
 0x132   :  { %4000 = vmatprep.mubr.msk.f32.mxu1 %vm4608_vm0, %v4609_v1 }
 0x19c   :  { %v4312_v32 = vpop.permute.xlu1 %4311 }
 0x19d   :  { %v4314_v60 = vunpack.i.h.bf16 %v4312_v32  ;;  %v4313_v61 = vunpack.i.l.bf16 %v4312_v32 }
 0x19f   :  { %v4214_v2 = vpack.c.bf16 %v4314_v60, %v4313_v61 }
 0x1a0   :  { %v4317_v33 = vpop.permute.xlu1 %4316 }
 0x1a1   :  { %v4319_v34 = vunpack.i.h.bf16 %v4317_v33  ;;  %v4318_v35 = vunpack.i.l.bf16 %v4317_v33 }
 0x1a3   :  { %v4217_v36 = vpack.c.bf16 %v4319_v34, %v4318_v35 }
 0x1a5   :  { %4219 = vmatpush3.bf16.xpose.msk.msra.mxu1 %vm4791_vm3, %v4217_v36 }
 0x1a6   :  { %4230 = vmatprep.subr.bf16.mxu1 %v4607_v0 }
 0x200   :  { %v369_v37 = vpop.f32.mrb[4].mxu0 }
 0x201   :  { %v3974_v38 = vpop.f32.mrb[5].mxu0  ;;  %v450_v39 = vsel %vm449_vm4, %v369_v37, -inf }
 0x202   :  { %451 = vmax.xlane.f32.xlu0 %v450_v39 }
 0x204   :  { %v445_v40 = vpop.f32.mrb[2].mxu1 }
 0x205   :  { %v3981_v41 = vpop.f32.mrb[3].mxu1  ;;  %v453_v42 = vsel %vm449_vm4, %v445_v40, -inf }
 0x206   :  { %454 = vmax.xlane.f32.xlu0 %v453_v42 }
 0x21c   :  { %4306 = vrot.lane.b32.xlu0 %v4822_v31, %s4610_s13 }
 0x220   :  { %4321 = vrot.lane.b32.xlu0 %v4809_v27, %s4611_s3 }
 0x28f   :  { %v452_v43 = vpop.xlane.xlu0 %451 }
 0x290   :  { %v456_v44 = vsub.f32 %v369_v37, %v452_v43 }
 0x292   :  { %v458_v45 = vmul.f32 1.442695, %v456_v44 }
 0x293   :  { %v455_v46 = vpop.xlane.xlu0 %454 }
 0x294   :  { %4375 = vpow2.f32 %v458_v45  ;;  %v457_v47 = vsub.f32 %v445_v40, %v455_v46 }
 0x296   :  { %v460_v48 = vmul.f32 1.442695, %v457_v47 }
 0x297   :  { %v4307_v49 = vpop.permute.xlu0 %4306 }
 0x298   :  { %4377 = vpow2.f32 %v460_v48  ;;  %v4309_v50 = vunpack.i.h.bf16 %v4307_v49  ;;  %v4308_v51 = vunpack.i.l.bf16 %v4307_v49 }
 0x29a   :  { %v4211_v52 = vpack.c.bf16 %v4309_v50, %v4308_v51 }
 0x29b   :  { %v4322_v4 = vpop.permute.xlu0 %4321 }
 0x29c   :  { %4212 = vmatpush3.bf16.msra.mxu0 %v4211_v52  ;;  %v4324_v6 = vunpack.i.h.bf16 %v4322_v4  ;;  %v4323_v7 = vunpack.i.l.bf16 %v4322_v4 }
 0x29d   :  { %4213 = vmatprep.subr.bf16.mxu0 %v4607_v0 }
 0x29e   :  { %v4376_v53 = vpop.eup %4375  ;;  %v4221_v8 = vpack.c.bf16 %v4324_v6, %v4323_v7 }
 0x29f   :  { %v462_v54 = vsel %vm449_vm4, %v4376_v53, 0.0 }
 0x2a0   :  { %463 = vadd.xlane.f32.xlu1 %v462_v54 }
 0x2a2   :  { %v4378_v55 = vpop.eup %4377 }
 0x2a3   :  { %v465_v56 = vsel %vm449_vm4, %v4378_v55, 0.0 }
 0x2a4   :  { %466 = vadd.xlane.f32.xlu1 %v465_v56 }
 0x2b5   :  { %632 = vrot.lane.b32.xlu1 %v4813_v29, %s4611_s3 }
 0x32d   :  { %v464_v57 = vpop.xlane.xlu1 %463 }
 0x32e   :  { %4379 = vrcp.f32 %v464_v57 }
 0x331   :  { %v467_v58 = vpop.xlane.xlu1 %466 }
 0x332   :  { %4381 = vrcp.f32 %v467_v58 }
 0x335   :  { %v633_v59 = vpop.permute.xlu1 %632 }
 0x336   :  { %4001 = vmatmul.mubr.msk.f32.vlgmr.msra.gmra.mrb[4].mxu1 %vm106_vm1, %v633_v59 }
 0x337   :  { %4028 = vmatprep.mubr.msk.f32.mxu1 %vm4608_vm0, %v4609_v1 }
 0x338   :  { %v4380_v62 = vpop.eup %4379 }
 0x339   :  { %v470_v63 = vmul.f32 %v4380_v62, %v4376_v53 }
 0x33b   :  { %3987 = vmatmul.mubr.msk.f32.vlgmr.msra.gmra.mrb[6].mxu0 %vm449_vm4, %v470_v63 }
 0x33c   :  { %v4382_v3 = vpop.eup %4381  ;;  %4215 = vmatpush3.bf16.msra.mxu0 %v4214_v2  ;;  %3993 = vmatprep.mubr.msk.f32.mxu0 %vm4608_vm0, %v4609_v1 }
 0x33d   :  { %v471_v5 = vmul.f32 %v4382_v3, %v4378_v55  ;;  %4220 = vmatprep.subr.bf16.mxu0 %v4607_v0 }
 0x33f   :  { %3994 = vmatmul.mubr.msk.f32.vlgmr.msra.gmra.mrb[8].mxu0 %vm449_vm4, %v471_v5 }
 0x340   :  { %4007 = vmatprep.mubr.msk.f32.mxu0 %vm4608_vm0, %v4609_v1 }
 0x345   :  { %4223 = vmatpush3.bf16.xpose.msk.msra.mxu0 %vm4791_vm3, %v4221_v8 }
 0x346   :  { %4224 = vmatprep.subr.bf16.mxu0 %v4607_v0 }
 0x34c   :  { %4008 = vmatmul.mubr.msk.f32.vlgmr.msra.gmra.mrb[10].mxu0 %vm106_vm1, %v633_v59 }
 0x34d   :  { %4014 = vmatprep.mubr.msk.f32.mxu0 %vm4608_vm0, %v4609_v1 }
 0x409   :  { %v710_v9 = vpop.f32.mrb[4].mxu1 }
 0x40a   :  { %v4002_v10 = vpop.f32.mrb[5].mxu1  ;;  %v792_v11 = vsel %vm449_vm4, %v710_v9, -inf }
 0x40b   :  { %793 = vmax.xlane.f32.xlu1 %v792_v11 }
 0x40e   :  { %v4865_v12 = vpop.f32.mrb[6].mxu0 }
 0x40f   :  { %v3988_v13 = vpop.f32.mrb[7].mxu0 }
 0x412   :  { %v4867_v14 = vpop.f32.mrb[8].mxu0 }
 0x413   :  { %v3995_v15 = vpop.f32.mrb[9].mxu0 }
 0x41c   :  { %4326 = vrot.lane.b32.xlu1 %v4822_v31, %s4612_s8 }
 0x41f   :  { %v788_v17 = vpop.f32.mrb[10].mxu0 }
 0x420   :  { %v4009_v20 = vpop.f32.mrb[11].mxu0  ;;  %4336 = vrot.lane.b32.xlu1 %v4822_v31, %s4613_s28  ;;  %v795_v21 = vsel %vm449_vm4, %v788_v17, -inf }
 0x421   :  { %796 = vmax.xlane.f32.xlu0 %v795_v21 }
 0x424   :  { %4341 = vrot.lane.b32.xlu1 %v4809_v27, %s4613_s28 }
 0x428   :  { %982 = vrot.lane.b32.xlu1 %v4813_v29, %s4613_s28 }
 0x498   :  { %v794_v23 = vpop.xlane.xlu1 %793 }
 0x499   :  { %v798_v25 = vsub.f32 %v710_v9, %v794_v23 }
 0x49b   :  { %v800_v26 = vmul.f32 1.442695, %v798_v25 }
 0x49c   :  { %v4327_v28 = vpop.permute.xlu1 %4326 }
 0x49d   :  { %4383 = vpow2.f32 %v800_v26  ;;  %v4329_v30 = vunpack.i.h.bf16 %v4327_v28  ;;  %v4328_v32 = vunpack.i.l.bf16 %v4327_v28 }
 0x49f   :  { %v4225_v33 = vpack.c.bf16 %v4329_v30, %v4328_v32 }
 0x4a0   :  { %v4337_v34 = vpop.permute.xlu1 %4336 }
 0x4a1   :  { %v4339_v35 = vunpack.i.h.bf16 %v4337_v34  ;;  %v4338_v36 = vunpack.i.l.bf16 %v4337_v34  ;;  %4226 = vmatpush3.bf16.msra.mxu0 %v4225_v33 }
 0x4a2   :  { %4227 = vmatprep.subr.bf16.mxu0 %v4607_v0 }
 0x4a3   :  { %v4231_v37 = vpack.c.bf16 %v4339_v35, %v4338_v36 }
 0x4a4   :  { %v4342_v38 = vpop.permute.xlu1 %4341 }
 0x4a5   :  { %4233 = vmatpush3.bf16.xpose.msk.msra.mxu1 %vm4791_vm3, %v4231_v37  ;;  %v4344_v56 = vunpack.i.h.bf16 %v4342_v38  ;;  %v4343_v57 = vunpack.i.l.bf16 %v4342_v38 }
 0x4a6   :  { %4238 = vmatprep.subr.bf16.mxu1 %v4607_v0 }
 0x4a7   :  { %v4384_v39 = vpop.eup %4383  ;;  %v4235_v59 = vpack.c.bf16 %v4344_v56, %v4343_v57 }
 0x4a8   :  { %v804_v40 = vsel %vm449_vm4, %v4384_v39, 0.0  ;;  %v983_v41 = vpop.permute.xlu1 %982 }
 0x4a9   :  { %805 = vadd.xlane.f32.xlu0 %v804_v40 }
 0x4ac   :  { %4029 = vmatmul.mubr.msk.f32.vlgmr.msra.gmra.mrb[6].mxu1 %vm106_vm1, %v983_v41 }
 0x4ad   :  { %4042 = vmatprep.mubr.msk.f32.mxu1 %vm4608_vm0, %v4609_v1 }
 0x4ae   :  { %v797_v42 = vpop.xlane.xlu0 %796 }
 0x4af   :  { %v799_v43 = vsub.f32 %v788_v17, %v797_v42 }
 0x4b1   :  { %v802_v44 = vmul.f32 1.442695, %v799_v43 }
 0x4b3   :  { %4385 = vpow2.f32 %v802_v44 }
 0x4bd   :  { %v4386_v45 = vpop.eup %4385 }
 0x4be   :  { %v807_v46 = vsel %vm449_vm4, %v4386_v45, 0.0 }
 0x4bf   :  { %808 = vadd.xlane.f32.xlu0 %v807_v46 }
 0x4d5   :  { %4331 = vrot.lane.b32.xlu0 %v4809_v27, %s4612_s8 }
 0x536   :  { %v806_v47 = vpop.xlane.xlu0 %805 }
 0x537   :  { %4387 = vrcp.f32 %v806_v47 }
 0x541   :  { %v4388_v48 = vpop.eup %4387 }
 0x542   :  { %v812_v49 = vmul.f32 %v4388_v48, %v4384_v39 }
 0x544   :  { %4015 = vmatmul.mubr.msk.f32.vlgmr.msra.gmra.mrb[12].mxu0 %vm449_vm4, %v812_v49 }
 0x545   :  { %4021 = vmatprep.mubr.msk.f32.mxu0 %vm4608_vm0, %v4609_v1 }
 0x54c   :  { %v809_v50 = vpop.xlane.xlu0 %808 }
 0x54d   :  { %4389 = vrcp.f32 %v809_v50 }
 0x550   :  { %v4332_v51 = vpop.permute.xlu0 %4331 }
 0x551   :  { %v4334_v52 = vunpack.i.h.bf16 %v4332_v51  ;;  %v4333_v53 = vunpack.i.l.bf16 %v4332_v51 }
 0x553   :  { %v4228_v54 = vpack.c.bf16 %v4334_v52, %v4333_v53 }
 0x555   :  { %4229 = vmatpush3.bf16.msra.mxu0 %v4228_v54 }
 0x556   :  { %4234 = vmatprep.subr.bf16.mxu0 %v4607_v0 }
 0x557   :  { %v4390_v55 = vpop.eup %4389 }
 0x558   :  { %v813_v58 = vmul.f32 %v4390_v55, %v4386_v45 }
 0x55a   :  { %4022 = vmatmul.mubr.msk.f32.vlgmr.msra.gmra.mrb[14].mxu0 %vm449_vm4, %v813_v58 }
 0x55b   :  { %4035 = vmatprep.mubr.msk.f32.mxu0 %vm4608_vm0, %v4609_v1 }
 0x55e   :  { %4237 = vmatpush3.bf16.xpose.msk.msra.mxu0 %vm4791_vm3, %v4235_v59 }
 0x55f   :  { %4241 = vmatprep.subr.bf16.mxu0 %v4607_v0 }
 0x565   :  { %4036 = vmatmul.mubr.msk.f32.vlgmr.msra.gmra.mrb[16].mxu0 %vm106_vm1, %v983_v41 }
 0x566   :  { %4049 = vmatprep.mubr.msk.f32.mxu0 %vm4608_vm0, %v4609_v1 }
 0x57f   :  { %v1060_v60 = vpop.f32.mrb[6].mxu1 }
 0x580   :  { %v4030_v61 = vpop.f32.mrb[7].mxu1  ;;  %v1142_v62 = vsel %vm449_vm4, %v1060_v60, -inf }
 0x581   :  { %1143 = vmax.xlane.f32.xlu0 %v1142_v62 }
 0x60e   :  { %v1144_v63 = vpop.xlane.xlu0 %1143 }
 0x60f   :  { %v1148_v2 = vsub.f32 %v1060_v60, %v1144_v63 }
 0x611   :  { %v1150_v3 = vmul.f32 1.442695, %v1148_v2 }
 0x613   :  { %4391 = vpow2.f32 %v1150_v3 }
 0x617   :  { %v4903_v4 = vpop.f32.mrb[12].mxu0 }
 0x618   :  { %v4016_v5 = vpop.f32.mrb[13].mxu0 }
 0x61d   :  { %v4392_v6 = vpop.eup %4391 }
 0x61e   :  { %v1154_v7 = vsel %vm449_vm4, %v4392_v6, 0.0 }
 0x61f   :  { %1155 = vadd.xlane.f32.xlu0 %v1154_v7 }
 0x62d   :  { %v4906_v8 = vpop.f32.mrb[14].mxu0 }
 0x62e   :  { %v4023_v9 = vpop.f32.mrb[15].mxu0 }
 0x638   :  { %v1138_v10 = vpop.f32.mrb[16].mxu0 }
 0x639   :  { %v4037_v11 = vpop.f32.mrb[17].mxu0  ;;  %v1145_v13 = vsel %vm449_vm4, %v1138_v10, -inf }
 0x63a   :  { %1146 = vmax.xlane.f32.xlu1 %v1145_v13 }
 0x64b   :  { %4351 = vrot.lane.b32.xlu1 %v4809_v27, %s4614_s14 }
 0x64f   :  { %4356 = vrot.lane.b32.xlu1 %v4822_v31, %s4615_s15 }
 0x653   :  { %4361 = vrot.lane.b32.xlu1 %v4809_v27, %s4615_s15 }
 0x6ac   :  { %v1156_v32 = vpop.xlane.xlu0 %1155 }
 0x6c7   :  { %v1147_v15 = vpop.xlane.xlu1 %1146 }
 0x6c8   :  { %v1149_v17 = vsub.f32 %v1138_v10, %v1147_v15 }
 0x6ca   :  { %v1152_v20 = vmul.f32 1.442695, %v1149_v17 }
 0x6cb   :  { %v4352_v21 = vpop.permute.xlu1 %4351 }
 0x6cc   :  { %4393 = vpow2.f32 %v1152_v20  ;;  %v4354_v23 = vunpack.i.h.bf16 %v4352_v21  ;;  %v4353_v25 = vunpack.i.l.bf16 %v4352_v21 }
 0x6cd   :  { %4395 = vrcp.f32 %v1156_v32  ;;  %v292_v32 = vld [vmem:[%s5256_s6 + $0x18] sm:$0xff] }
 0x6ce   :  { %v4242_v26 = vpack.c.bf16 %v4354_v23, %v4353_v25 }
 0x6cf   :  { %v4357_v33 = vpop.permute.xlu1 %4356 }
 0x6d0   :  { %4243 = vmatpush3.bf16.msra.mxu0 %v4242_v26  ;;  %v4359_v45 = vunpack.i.h.bf16 %v4357_v33  ;;  %v4358_v46 = vunpack.i.l.bf16 %v4357_v33  ;;  %v290_v26 = vld [vmem:[%s5256_s6 + $0x8] sm:$0xff] }
 0x6d1   :  { %4248 = vmatprep.subr.bf16.mxu0 %v4607_v0 }
 0x6d2   :  { %v4245_v49 = vpack.c.bf16 %v4359_v45, %v4358_v46 }
 0x6d3   :  { %v4362_v38 = vpop.permute.xlu1 %4361 }
 0x6d4   :  { %v4364_v41 = vunpack.i.h.bf16 %v4362_v38  ;;  %v4363_v42 = vunpack.i.l.bf16 %v4362_v38 }
 0x6d6   :  { %v4394_v28 = vpop.eup %4393  ;;  %v4249_v48 = vpack.c.bf16 %v4364_v41, %v4363_v42 }
 0x6d7   :  { %v1157_v30 = vsel %vm449_vm4, %v4394_v28, 0.0  ;;  %v4396_v39 = vpop.eup %4395 }
 0x6d8   :  { %1158 = vadd.xlane.f32.xlu0 %v1157_v30  ;;  %v1162_v43 = vmul.f32 %v4396_v39, %v4392_v6  ;;  %v291_v30 = vld [vmem:[%s5256_s6 + $0x10] sm:$0xff] }
 0x6d9   :  { %v4262_v33 = vpack.c.bf16 %v292_v32, %v291_v30 }
 0x6ee   :  { %4346 = vrot.lane.b32.xlu0 %v4822_v31, %s4614_s14 }
 0x6f2   :  { %1332 = vrot.lane.b32.xlu0 %v4813_v29, %s4615_s15 }
 0x765   :  { %v1159_v34 = vpop.xlane.xlu0 %1158 }
 0x766   :  { %4397 = vrcp.f32 %v1159_v34 }
 0x769   :  { %v4347_v35 = vpop.permute.xlu0 %4346 }
 0x76a   :  { %v4349_v36 = vunpack.i.h.bf16 %v4347_v35  ;;  %v4348_v37 = vunpack.i.l.bf16 %v4347_v35 }
 0x76c   :  { %v4239_v40 = vpack.c.bf16 %v4349_v36, %v4348_v37 }
 0x76d   :  { %v1333_v50 = vpop.permute.xlu0 %1332 }
 0x76e   :  { %4240 = vmatpush3.bf16.msra.mxu1 %v4239_v40 }
 0x76f   :  { %4244 = vmatprep.subr.bf16.mxu1 %v4607_v0 }
 0x770   :  { %v4398_v44 = vpop.eup %4397 }
 0x771   :  { %4043 = vmatmul.mubr.msk.f32.vlgmr.msra.gmra.mrb[8].mxu1 %vm449_vm4, %v1162_v43  ;;  %v1163_v47 = vmul.f32 %v4398_v44, %v4394_v28  ;;  %v630_v43 = vadd.f32 %v4865_v12, %v4813_v29 }
 0x772   :  { %4056 = vmatprep.mubr.msk.f32.mxu1 %vm4608_vm0, %v4609_v1 }
 0x773   :  { %4050 = vmatmul.mubr.msk.f32.vlgmr.msra.gmra.mrb[18].mxu0 %vm449_vm4, %v1163_v47 }
 0x774   :  { %4251 = vmatpush3.bf16.xpose.msk.msra.mxu0 %vm4791_vm3, %v4249_v48  ;;  %4063 = vmatprep.mubr.msk.f32.mxu0 %vm4608_vm0, %v4609_v1 }
 0x775   :  { %4255 = vmatprep.subr.bf16.mxu0 %v4607_v0 }
 0x777   :  { %4247 = vmatpush3.bf16.xpose.msk.msra.mxu1 %vm4791_vm3, %v4245_v49 }
 0x778   :  { %4252 = vmatprep.subr.bf16.mxu1 %v4607_v0 }
 0x77b   :  { %4064 = vmatmul.mubr.msk.f32.vlgmr.msra.gmra.mrb[20].mxu0 %vm106_vm1, %v1333_v50 }
 0x77c   :  { %4077 = vmatprep.mubr.msk.f32.mxu0 %vm4608_vm0, %v4609_v1 }
 0x77e   :  { %4057 = vmatmul.mubr.msk.f32.vlgmr.msra.gmra.mrb[10].mxu1 %vm106_vm1, %v1333_v50 }
 0x77f   :  { %4070 = vmatprep.mubr.msk.f32.mxu1 %vm4608_vm0, %v4609_v1 }
 0x844   :  { %v1239_v51 = vpop.f32.mrb[8].mxu1 }
 0x845   :  { %v4044_v52 = vpop.f32.mrb[9].mxu1 }
 0x846   :  { %v1318_v53 = vpop.f32.mrb[18].mxu0 }
 0x847   :  { %v4051_v54 = vpop.f32.mrb[19].mxu0 }
 0x84e   :  { %v1488_v55 = vpop.f32.mrb[20].mxu0 }
 0x84f   :  { %v4065_v19 = vpop.f32.mrb[21].mxu0  ;;  %v1495_v56 = vsel %vm449_vm4, %v1488_v55, -inf }
 0x850   :  { %1496 = vmax.xlane.f32.xlu0 %v1495_v56 }
 0x851   :  { %v1410_v0 = vpop.f32.mrb[10].mxu1 }
 0x852   :  { %v4058_v57 = vpop.f32.mrb[11].mxu1  ;;  %v1492_v58 = vsel %vm449_vm4, %v1410_v0, -inf }
 0x853   :  { %1493 = vmax.xlane.f32.xlu1 %v1492_v58  ;;  %v1790_v58 = vld [vmem:[#allocation7 + $0x10] sm:$0xff] }
 0x864   :  { %4366 = vrot.lane.b32.xlu1 %v4822_v31, %s4616_s10 }
 0x868   :  { %974 = vrot.lane.b32.xlu1 %v4903_v4, %s4605_s24 }
 0x86c   :  { %976 = vrot.lane.b32.xlu1 %v4906_v8, %s4605_s24 }
 0x870   :  { %1324 = vrot.lane.b32.xlu1 %v1239_v51, %s4617_s16  ;;  %v631_v51 = vadd.f32 %v4867_v14, %v4813_v29  ;;  %v1789_v14 = vld [vmem:[#allocation7 + $0x8] sm:$0xff] }
 0x8dd   :  { %v1497_v1 = vpop.xlane.xlu0 %1496 }
 0x8de   :  { %v1499_v59 = vsub.f32 %v1488_v55, %v1497_v1  ;;  %v1791_v1 = vld [vmem:[#allocation7 + $0x18] sm:$0xff] }
 0x8e0   :  { %v1494_v60 = vpop.xlane.xlu1 %1493  ;;  %v1502_v62 = vmul.f32 1.442695, %v1499_v59  ;;  %v4270_v59 = vpack.c.bf16 %v1791_v1, %v1790_v58 }
 0x8e1   :  { %v1498_v61 = vsub.f32 %v1410_v0, %v1494_v60  ;;  %v1788_v0 = vld [vmem:[#allocation7] sm:$0xff] }
 0x8e2   :  { %v4266_v57 = vpack.c.bf16 %v1789_v14, %v1788_v0 }
 0x8e3   :  { %v1500_v63 = vmul.f32 1.442695, %v1498_v61 }
 0x8e4   :  { %v4367_v2 = vpop.permute.xlu1 %4366 }
 0x8e5   :  { %4399 = vpow2.f32 %v1500_v63  ;;  %v4369_v3 = vunpack.i.h.bf16 %v4367_v2  ;;  %v4368_v5 = vunpack.i.l.bf16 %v4367_v2 }
 0x8e6   :  { %4401 = vpow2.f32 %v1502_v62 }
 0x8e7   :  { %v4253_v31 = vpack.c.bf16 %v4369_v3, %v4368_v5 }
 0x8e8   :  { %v975_v38 = vpop.permute.xlu1 %974 }
 0x8e9   :  { %4254 = vmatpush3.bf16.msra.mxu1 %v4253_v31  ;;  %v980_v41 = vadd.f32 %v975_v38, %v4813_v29 }
 0x8eb   :  { %v1682_v46 = vsel %vm106_vm1, %v630_v43, %v980_v41 }
 0x8ec   :  { %v977_v39 = vpop.permute.xlu1 %976 }
 0x8ed   :  { %v981_v47 = vadd.f32 %v977_v39, %v4813_v29 }
 0x8ef   :  { %v4400_v6 = vpop.eup %4399 }
 0x8f0   :  { %v1504_v4 = vsel %vm449_vm4, %v4400_v6, 0.0  ;;  %v4402_v7 = vpop.eup %4401  ;;  %v1325_v40 = vpop.permute.xlu1 %1324 }
 0x8f1   :  { %1505 = vadd.xlane.f32.xlu0 %v1504_v4  ;;  %v1507_v8 = vsel %vm449_vm4, %v4402_v7, 0.0  ;;  %v1330_v42 = vadd.f32 %v1325_v40, %v4813_v29 }
 0x8f3   :  { %v1684_v49 = vsel %vm449_vm4, %v1682_v46, %v1330_v42 }
 0x8f5   :  { %1508 = vadd.xlane.f32.xlu0 %v1507_v8 }
 0x90b   :  { %4371 = vrot.lane.b32.xlu0 %v4809_v27, %s4616_s10  ;;  %v289_v27 = vld [vmem:[%s5256_s6] sm:$0xff] }
 0x90c   :  { %v4258_v28 = vpack.c.bf16 %v290_v26, %v289_v27 }
 0x90e   :  { %4259 = vmatprep.subr.bf16.mxu1 %v4258_v28 }
 0x90f   :  { %1326 = vrot.lane.b32.xlu0 %v1318_v53, %s4617_s16  ;;  %v1683_v53 = vsel %vm106_vm1, %v631_v51, %v981_v47 }
 0x97e   :  { %v1506_v9 = vpop.xlane.xlu0 %1505 }
 0x97f   :  { %4403 = vrcp.f32 %v1506_v9 }
 0x982   :  { %v1509_v10 = vpop.xlane.xlu0 %1508 }
 0x983   :  { %4405 = vrcp.f32 %v1509_v10 }
 0x986   :  { %v4372_v11 = vpop.permute.xlu0 %4371 }
 0x987   :  { %v4374_v13 = vunpack.i.h.bf16 %v4372_v11  ;;  %v4373_v15 = vunpack.i.l.bf16 %v4372_v11 }
 0x989   :  { %v4404_v17 = vpop.eup %4403  ;;  %v4256_v20 = vpack.c.bf16 %v4374_v13, %v4373_v15 }
 0x98a   :  { %v1512_v21 = vmul.f32 %v4404_v17, %v4400_v6  ;;  %v1327_v44 = vpop.permute.xlu0 %1326  ;;  %v3775_v17 = vld [vmem:[%s5259_s9] ss:$0 sm:$0xff]  ;;  %s4620_s9 = smov 56  }
 0x98b   :  { %4257 = vmatpush3.bf16.msra.mxu0 %v4256_v20  ;;  %v1331_v50 = vadd.f32 %v1327_v44, %v4813_v29 }
 0x98c   :  { %4071 = vmatmul.mubr.msk.f32.vlgmr.msra.gmra.mrb[12].mxu1 %vm449_vm4, %v1512_v21  ;;  %4267 = vmatprep.subr.bf16.mxu0 %v4266_v57 }
 0x98d   :  { %v4406_v23 = vpop.eup %4405  ;;  %4261 = vmatpush3.bf16.msra.mxu1 %v4258_v28  ;;  %v1685_v55 = vsel %vm449_vm4, %v1683_v53, %v1331_v50 }
 0x98e   :  { %v1513_v25 = vmul.f32 %v4406_v23, %v4402_v7  ;;  %4263 = vmatprep.subr.bf16.mxu1 %v4262_v33 }
 0x990   :  { %4078 = vmatmul.mubr.msk.f32.vlgmr.msra.gmra.mrb[22].mxu0 %vm449_vm4, %v1513_v25 }
 0x991   :  { %4265 = vmatpush3.bf16.msra.mxu1 %v4262_v33  ;;  %4269 = vmatpush3.bf16.msra.mxu0 %v4266_v57 }
 0x992   :  { %4271 = vmatprep.subr.bf16.mxu0 %v4270_v59 }
 0x995   :  { %4273 = vmatpush3.bf16.msra.mxu0 %v4270_v59 }
 0xa5f   :  { %v1589_v34 = vpop.f32.mrb[12].mxu1 }
 0xa60   :  { %1674 = vrot.lane.b32.xlu1 %v1589_v34, %s4618_s4  ;;  %v4072_v35 = vpop.f32.mrb[13].mxu1 }
 0xa63   :  { %v1668_v36 = vpop.f32.mrb[22].mxu0 }
 0xa64   :  { %1885 = vrot.lane.b32.xlu1 %v4787_v18, %s4619_s22  ;;  %1676 = vrot.lane.b32.xlu0 %v1668_v36, %s4618_s4  ;;  %v4079_v37 = vpop.f32.mrb[23].mxu0 }
 0xa68   :  { %1971 = vrot.lane.b32.xlu1 %v4799_v24, %s4619_s22  ;;  %1887 = vrot.lane.b32.xlu0 %v4785_v16, %s4619_s22 }
 0xa6c   :  { %1973 = vrot.lane.b32.xlu0 %v4797_v22, %s4619_s22 }
 0xad2   :  { %v1675_v45 = vpop.permute.xlu1 %1674 }
 0xad3   :  { %v1680_v48 = vadd.f32 %v1675_v45, %v4813_v29 }
 0xad5   :  { %v1687_v52 = vsel %vm1686_vm5, %v1684_v49, %v1680_v48 }
 0xad6   :  { %4088 = vmatprep.mubr.msk.f32.mxu1 %vm215_vm2, %v1687_v52  ;;  %v1677_v12 = vpop.permute.xlu0 %1676  ;;  %v1886_v56 = vpop.permute.xlu1 %1885 }
 0xad7   :  { %v1681_v54 = vadd.f32 %v1677_v12, %v4813_v29  ;;  %v3772_v29 = vld [vmem:[%s5257_s7] ss:$0 sm:$0xff] }
 0xad9   :  { %v1688_v19 = vsel %vm1686_vm5, %v1685_v55, %v1681_v54 }
 0xada   :  { %4089 = vmatmul.mubr.msk.f32.vlgmr.msra.gmra.mrb[14].mxu1 %vm215_vm2, %v1688_v19  ;;  %v1972_v15 = vpop.permute.xlu1 %1971  ;;  %v1888_v20 = vpop.permute.xlu0 %1887 }
 0xadb   :  { %4104 = vmatprep.mubr.msk.f32.mxu1 %vm106_vm1, %v1886_v56 }
 0xade   :  { %v1974_v26 = vpop.permute.xlu0 %1973 }
 0xbad   :  { %v4090_v60 = vpop.f32.mrb[14].mxu1 }
 0xbae   :  { %v1773_v61 = vadd.f32 %v4090_v60, %v3772_v29  ;;  %v1767_v62 = vpop.f32.mrb[15].mxu1 }
 0xbaf   :  { %v1768_v63 = vadd.f32 %v3772_v29, %v1767_v62 }
 0xbb0   :  { %v1779_v2 = vmul.f32 0.70710677, %v1773_v61  ;;  %v1777_v6 = vmul.f32 0.5, %v1773_v61 }
 0xbb1   :  { %v1778_v3 = vmul.f32 0.70710677, %v1768_v63  ;;  %v1776_v7 = vmul.f32 0.5, %v1768_v63 }
 0xbb2   :  { %4407 = verf.f32 %v1779_v2 }
 0xbb3   :  { %4409 = verf.f32 %v1778_v3 }
 0xbbc   :  { %v4408_v5 = vpop.eup %4407 }
 0xbbd   :  { %v4410_v31 = vpop.eup %4409  ;;  %v1783_v4 = vadd.f32 1.0, %v4408_v5 }
 0xbbe   :  { %v1782_v8 = vadd.f32 1.0, %v4410_v31 }
 0xbbf   :  { %v1785_v9 = vmul.f32 %v1783_v4, %v1777_v6 }
 0xbc0   :  { %v1784_v10 = vmul.f32 %v1782_v8, %v1776_v7 }
 0xbc1   :  { %v1787_v13 = vadd.f32 %v1785_v9, %v1688_v19 }
 0xbc2   :  { %v1786_v11 = vadd.f32 %v1784_v10, %v1687_v52 }
 0xbc4   :  { %4099 = vmatprep.mubr.msk.f32.mxu0 %vm215_vm2, %v1786_v11 }
 0xbc5   :  { %4100 = vmatmul.mubr.msk.f32.vlgmr.msra.gmra.mrb[24].mxu0 %vm215_vm2, %v1787_v13 }
 0xbc6   :  { %4109 = vmatprep.mubr.msk.f32.mxu0 %vm106_vm1, %v1972_v15 }
 0xc98   :  { %v4101_v21 = vpop.f32.mrb[24].mxu0 }
 0xc99   :  { %v5002_v23 = vadd.f32 %v4101_v21, %v3775_v17  ;;  %v1871_v25 = vpop.f32.mrb[25].mxu0 }
 0xc9a   :  { %v5004_v27 = vadd.f32 %v3775_v17, %v1871_v25 }
 0xc9b   :  { %4107 = vmatprep.subr.msk.mxu0 %vm106_vm1, %v5002_v23 }
 0xc9c   :  { %4102 = vmatprep.subr.msk.mxu1 %vm106_vm1, %v5004_v27  ;;  %4108 = vmatpush3.xpose.msk.msra.mxu0 %vm106_vm1, %v5002_v23 }
 0xc9d   :  { %4103 = vmatpush3.xpose.msk.msra.mxu1 %vm106_vm1, %v5004_v27 }
 0xc9f   :  { %4110 = vmatmul.mubr.msk.f32.vlgmr.msra.gmra.mrb[26].mxu0 %vm106_vm1, %v1974_v26 }
 0xca0   :  { %4105 = vmatmul.mubr.msk.f32.vlgmr.msra.gmra.mrb[16].mxu1 %vm106_vm1, %v1888_v20 }
 0xd72   :  { %v4111_v28 = vpop.f32.mrb[26].mxu0 }
 0xd73   :  { %v4106_v30 = vpop.f32.mrb[16].mxu1  ;;  %v2048_v32 = vpop.f32.mrb[27].mxu0  ;;  %v2066_v37 = vsel %vm106_vm1, %v4111_v28, -inf }
 0xd74   :  { %v1962_v33 = vpop.f32.mrb[17].mxu1  ;;  %v2060_v34 = vsel %vm106_vm1, %v4106_v30, -inf  ;;  %v2063_v36 = vsel %vm106_vm1, %v2048_v32, -inf }
 0xd75   :  { %2061 = vmax.xlane.f32.xlu0 %v2060_v34  ;;  %v2057_v35 = vsel %vm106_vm1, %v1962_v33, -inf }
 0xd76   :  { %2058 = vmax.xlane.f32.xlu1 %v2057_v35 }
 0xd79   :  { %2064 = vmax.xlane.f32.xlu0 %v2063_v36 }
 0xd7d   :  { %2067 = vmax.xlane.f32.xlu0 %v2066_v37 }
 0xd87   :  { %2101 = vrot.lane.b32.xlu1 %v5004_v27, %s4610_s13 }
 0xd8b   :  { %2293 = vrot.lane.b32.xlu1 %v5004_v27, %s4611_s3 }
 0xd8f   :  { %2289 = vrot.lane.b32.xlu1 %v4787_v18, %s4620_s9 }
 0xd93   :  { %2185 = vrot.lane.b32.xlu0 %v5002_v23, %s4610_s13  ;;  %2291 = vrot.lane.b32.xlu1 %v4785_v16, %s4620_s9 }
 0xe02   :  { %v2062_v38 = vpop.xlane.xlu0 %2061 }
 0xe03   :  { %v2059_v39 = vpop.xlane.xlu1 %2058  ;;  %v2070_v44 = vsub.f32 %v4106_v30, %v2062_v38 }
 0xe04   :  { %v2069_v40 = vsub.f32 %v1962_v33, %v2059_v39 }
 0xe05   :  { %v2075_v50 = vmul.f32 1.442695, %v2070_v44 }
 0xe06   :  { %v2065_v41 = vpop.xlane.xlu0 %2064  ;;  %v2073_v45 = vmul.f32 1.442695, %v2069_v40 }
 0xe07   :  { %v2071_v42 = vsub.f32 %v2048_v32, %v2065_v41  ;;  %v2102_v43 = vpop.permute.xlu1 %2101 }
 0xe08   :  { %4112 = vmatprep.subr.mxu1 %v2102_v43 }
 0xe09   :  { %v2077_v46 = vmul.f32 1.442695, %v2071_v42  ;;  %4113 = vmatpush3.msra.mxu1 %v2102_v43 }
 0xe0a   :  { %v2068_v47 = vpop.xlane.xlu0 %2067 }
 0xe0b   :  { %4411 = vpow2.f32 %v2077_v46  ;;  %v2072_v48 = vsub.f32 %v4111_v28, %v2068_v47  ;;  %v2294_v49 = vpop.permute.xlu1 %2293 }
 0xe0c   :  { %4122 = vmatprep.subr.msk.mxu1 %vm106_vm1, %v2294_v49  ;;  %4413 = vpow2.f32 %v2073_v45 }
 0xe0d   :  { %v2079_v51 = vmul.f32 1.442695, %v2072_v48 }
 0xe0e   :  { %v2186_v52 = vpop.permute.xlu0 %2185 }
 0xe0f   :  { %4415 = vpow2.f32 %v2079_v51  ;;  %4117 = vmatprep.subr.mxu0 %v2186_v52  ;;  %v2290_v57 = vpop.permute.xlu1 %2289 }
 0xe10   :  { %4118 = vmatpush3.msra.mxu0 %v2186_v52  ;;  %4417 = vpow2.f32 %v2075_v50 }
 0xe13   :  { %v2292_v58 = vpop.permute.xlu1 %2291 }
 0xe15   :  { %v4412_v12 = vpop.eup %4411 }
 0xe16   :  { %v2087_v53 = vsel %vm106_vm1, %v4412_v12, 0.0  ;;  %v4414_v54 = vpop.eup %4413 }
 0xe17   :  { %2088 = vadd.xlane.f32.xlu1 %v2087_v53  ;;  %v2081_v56 = vsel %vm106_vm1, %v4414_v54, 0.0 }
 0xe19   :  { %v4416_v55 = vpop.eup %4415 }
 0xe1a   :  { %v2090_v19 = vsel %vm106_vm1, %v4416_v55, 0.0  ;;  %v4418_v0 = vpop.eup %4417 }
 0xe1b   :  { %2091 = vadd.xlane.f32.xlu0 %v2090_v19  ;;  %2082 = vadd.xlane.f32.xlu1 %v2081_v56  ;;  %v2084_v14 = vsel %vm106_vm1, %v4418_v0, 0.0 }
 0xe1f   :  { %2085 = vadd.xlane.f32.xlu0 %v2084_v14 }
 0xe2c   :  { %2376 = vrot.lane.b32.xlu1 %v4799_v24, %s4620_s9 }
 0xe35   :  { %2380 = vrot.lane.b32.xlu0 %v5002_v23, %s4611_s3 }
 0xe39   :  { %2378 = vrot.lane.b32.xlu0 %v4797_v22, %s4620_s9 }
 0xea4   :  { %v2089_v1 = vpop.xlane.xlu1 %2088 }
 0xea5   :  { %4419 = vrcp.f32 %v2089_v1 }
 0xea8   :  { %v2092_v59 = vpop.xlane.xlu0 %2091  ;;  %v2083_v29 = vpop.xlane.xlu1 %2082 }
 0xea9   :  { %4421 = vrcp.f32 %v2092_v59 }
 0xeaa   :  { %4423 = vrcp.f32 %v2083_v29 }
 0xeac   :  { %v2086_v60 = vpop.xlane.xlu0 %2085  ;;  %v2377_v4 = vpop.permute.xlu1 %2376 }
 0xead   :  { %4425 = vrcp.f32 %v2086_v60 }
 0xeaf   :  { %v4420_v61 = vpop.eup %4419 }
 0xeb0   :  { %v2381_v62 = vpop.permute.xlu0 %2380  ;;  %v2099_v63 = vmul.f32 %v4420_v61, %v4412_v12 }
 0xeb1   :  { %4127 = vmatprep.subr.msk.mxu0 %vm106_vm1, %v2381_v62 }
 0xeb2   :  { %4119 = vmatprep.mubr.msk.f32.mxu0 %vm106_vm1, %v2099_v63 }
 0xeb3   :  { %v4422_v2 = vpop.eup %4421 }
 0xeb4   :  { %v4424_v3 = vpop.eup %4423  ;;  %v2100_v5 = vmul.f32 %v4422_v2, %v4416_v55  ;;  %v2379_v8 = vpop.permute.xlu0 %2378 }
 0xeb5   :  { %v2097_v31 = vmul.f32 %v4424_v3, %v4414_v54 }
 0xeb6   :  { %4120 = vmatmul.mubr.msk.f32.vlgmr.msra.gmra.mrb[28].mxu0 %vm106_vm1, %v2100_v5 }
 0xeb7   :  { %v4426_v6 = vpop.eup %4425  ;;  %4114 = vmatprep.mubr.msk.f32.mxu1 %vm106_vm1, %v2097_v31  ;;  %4128 = vmatpush3.xpose.msk.msra.mxu0 %vm106_vm1, %v2381_v62 }
 0xeb8   :  { %v2098_v7 = vmul.f32 %v4426_v6, %v4418_v0  ;;  %4129 = vmatprep.mubr.msk.f32.mxu0 %vm106_vm1, %v2377_v4 }
 0xeba   :  { %4115 = vmatmul.mubr.msk.f32.vlgmr.msra.gmra.mrb[18].mxu1 %vm106_vm1, %v2098_v7  ;;  %4130 = vmatmul.mubr.msk.f32.vlgmr.msra.gmra.mrb[30].mxu0 %vm106_vm1, %v2379_v8 }
 0xebb   :  { %4123 = vmatpush3.xpose.msk.msra.mxu1 %vm106_vm1, %v2294_v49  ;;  %4124 = vmatprep.mubr.msk.f32.mxu1 %vm106_vm1, %v2290_v57 }
 0xebe   :  { %4125 = vmatmul.mubr.msk.f32.vlgmr.msra.gmra.mrb[20].mxu1 %vm106_vm1, %v2292_v58 }
 0xf89   :  { %v5052_v9 = vpop.f32.mrb[28].mxu0 }
 0xf8a   :  { %v5054_v10 = vpop.f32.mrb[29].mxu0 }
 0xf8d   :  { %v5056_v11 = vpop.f32.mrb[18].mxu1  ;;  %v4131_v13 = vpop.f32.mrb[30].mxu0 }
 0xf8e   :  { %v5058_v15 = vpop.f32.mrb[19].mxu1  ;;  %v2454_v17 = vpop.f32.mrb[31].mxu0  ;;  %v2472_v30 = vsel %vm106_vm1, %v4131_v13, -inf }
 0xf8f   :  { %v2469_v28 = vsel %vm106_vm1, %v2454_v17, -inf }
 0xf91   :  { %v4126_v20 = vpop.f32.mrb[20].mxu1 }
 0xf92   :  { %v2367_v21 = vpop.f32.mrb[21].mxu1  ;;  %v2466_v25 = vsel %vm106_vm1, %v4126_v20, -inf }
 0xf93   :  { %2467 = vmax.xlane.f32.xlu0 %v2466_v25  ;;  %v2463_v26 = vsel %vm106_vm1, %v2367_v21, -inf }
 0xf94   :  { %2464 = vmax.xlane.f32.xlu1 %v2463_v26 }
 0xf97   :  { %2470 = vmax.xlane.f32.xlu0 %v2469_v28 }
 0xf9b   :  { %2473 = vmax.xlane.f32.xlu0 %v2472_v30 }
 0xfa5   :  { %2507 = vrot.lane.b32.xlu1 %v5004_v27, %s4612_s8 }
 0xfa9   :  { %2699 = vrot.lane.b32.xlu1 %v5004_v27, %s4613_s28 }
 0xfad   :  { %2695 = vrot.lane.b32.xlu1 %v4787_v18, %s4621_s2 }
 0xfb1   :  { %2697 = vrot.lane.b32.xlu1 %v4785_v16, %s4621_s2  ;;  %2591 = vrot.lane.b32.xlu0 %v5002_v23, %s4612_s8 }
0x1020   :  { %v2468_v32 = vpop.xlane.xlu0 %2467 }
0x1021   :  { %v2465_v33 = vpop.xlane.xlu1 %2464  ;;  %v2476_v38 = vsub.f32 %v4126_v20, %v2468_v32 }
0x1022   :  { %v2475_v34 = vsub.f32 %v2367_v21, %v2465_v33 }
0x1023   :  { %v2481_v44 = vmul.f32 1.442695, %v2476_v38 }
0x1024   :  { %v2471_v35 = vpop.xlane.xlu0 %2470  ;;  %v2479_v39 = vmul.f32 1.442695, %v2475_v34 }
0x1025   :  { %v2477_v36 = vsub.f32 %v2454_v17, %v2471_v35  ;;  %v2508_v37 = vpop.permute.xlu1 %2507 }
0x1026   :  { %4132 = vmatprep.subr.mxu1 %v2508_v37 }
0x1027   :  { %v2483_v40 = vmul.f32 1.442695, %v2477_v36  ;;  %4133 = vmatpush3.msra.mxu1 %v2508_v37 }
0x1028   :  { %v2474_v41 = vpop.xlane.xlu0 %2473 }
0x1029   :  { %4427 = vpow2.f32 %v2483_v40  ;;  %v2478_v42 = vsub.f32 %v4131_v13, %v2474_v41  ;;  %v2700_v43 = vpop.permute.xlu1 %2699 }
0x102a   :  { %4142 = vmatprep.subr.msk.mxu1 %vm106_vm1, %v2700_v43  ;;  %4429 = vpow2.f32 %v2479_v39 }
0x102b   :  { %v2485_v45 = vmul.f32 1.442695, %v2478_v42 }
0x102c   :  { %v2592_v46 = vpop.permute.xlu0 %2591 }
0x102d   :  { %4431 = vpow2.f32 %v2485_v45  ;;  %4137 = vmatprep.subr.mxu0 %v2592_v46  ;;  %v2696_v54 = vpop.permute.xlu1 %2695 }
0x102e   :  { %4138 = vmatpush3.msra.mxu0 %v2592_v46  ;;  %4433 = vpow2.f32 %v2481_v44 }
0x1031   :  { %v2698_v55 = vpop.permute.xlu1 %2697 }
0x1033   :  { %v4428_v47 = vpop.eup %4427 }
0x1034   :  { %v2493_v48 = vsel %vm106_vm1, %v4428_v47, 0.0  ;;  %v4430_v49 = vpop.eup %4429 }
0x1035   :  { %2494 = vadd.xlane.f32.xlu1 %v2493_v48  ;;  %v2487_v52 = vsel %vm106_vm1, %v4430_v49, 0.0 }
0x1037   :  { %v4432_v50 = vpop.eup %4431 }
0x1038   :  { %v2496_v51 = vsel %vm106_vm1, %v4432_v50, 0.0  ;;  %v4434_v12 = vpop.eup %4433 }
0x1039   :  { %2497 = vadd.xlane.f32.xlu0 %v2496_v51  ;;  %2488 = vadd.xlane.f32.xlu1 %v2487_v52  ;;  %v2490_v53 = vsel %vm106_vm1, %v4434_v12, 0.0 }
0x103d   :  { %2491 = vadd.xlane.f32.xlu0 %v2490_v53 }
0x104a   :  { %2782 = vrot.lane.b32.xlu1 %v4799_v24, %s4621_s2 }
0x1053   :  { %2786 = vrot.lane.b32.xlu0 %v5002_v23, %s4613_s28 }
0x1057   :  { %2784 = vrot.lane.b32.xlu0 %v4797_v22, %s4621_s2 }
0x10c2   :  { %v2495_v19 = vpop.xlane.xlu1 %2494 }
0x10c3   :  { %4435 = vrcp.f32 %v2495_v19 }
0x10c6   :  { %v2498_v56 = vpop.xlane.xlu0 %2497  ;;  %v2489_v0 = vpop.xlane.xlu1 %2488 }
0x10c7   :  { %4437 = vrcp.f32 %v2498_v56 }
0x10c8   :  { %4439 = vrcp.f32 %v2489_v0 }
0x10ca   :  { %v2492_v14 = vpop.xlane.xlu0 %2491  ;;  %v2783_v63 = vpop.permute.xlu1 %2782 }
0x10cb   :  { %4441 = vrcp.f32 %v2492_v14 }
0x10cd   :  { %v4436_v57 = vpop.eup %4435 }
0x10ce   :  { %v2787_v58 = vpop.permute.xlu0 %2786  ;;  %v2505_v1 = vmul.f32 %v4436_v57, %v4428_v47 }
0x10cf   :  { %4147 = vmatprep.subr.msk.mxu0 %vm106_vm1, %v2787_v58 }
0x10d0   :  { %4139 = vmatprep.mubr.msk.f32.mxu0 %vm106_vm1, %v2505_v1 }
0x10d1   :  { %v4438_v59 = vpop.eup %4437 }
0x10d2   :  { %v4440_v29 = vpop.eup %4439  ;;  %v2506_v60 = vmul.f32 %v4438_v59, %v4432_v50  ;;  %v2785_v3 = vpop.permute.xlu0 %2784 }
0x10d3   :  { %v2503_v61 = vmul.f32 %v4440_v29, %v4430_v49 }
0x10d4   :  { %4140 = vmatmul.mubr.msk.f32.vlgmr.msra.gmra.mrb[32].mxu0 %vm106_vm1, %v2506_v60 }
0x10d5   :  { %v4442_v62 = vpop.eup %4441  ;;  %4134 = vmatprep.mubr.msk.f32.mxu1 %vm106_vm1, %v2503_v61  ;;  %4148 = vmatpush3.xpose.msk.msra.mxu0 %vm106_vm1, %v2787_v58 }
0x10d6   :  { %v2504_v2 = vmul.f32 %v4442_v62, %v4434_v12  ;;  %4149 = vmatprep.mubr.msk.f32.mxu0 %vm106_vm1, %v2783_v63 }
0x10d8   :  { %4135 = vmatmul.mubr.msk.f32.vlgmr.msra.gmra.mrb[22].mxu1 %vm106_vm1, %v2504_v2  ;;  %4150 = vmatmul.mubr.msk.f32.vlgmr.msra.gmra.mrb[34].mxu0 %vm106_vm1, %v2785_v3 }
0x10d9   :  { %4143 = vmatpush3.xpose.msk.msra.mxu1 %vm106_vm1, %v2700_v43  ;;  %4144 = vmatprep.mubr.msk.f32.mxu1 %vm106_vm1, %v2696_v54 }
0x10dc   :  { %4145 = vmatmul.mubr.msk.f32.vlgmr.msra.gmra.mrb[24].mxu1 %vm106_vm1, %v2698_v55 }
0x11a7   :  { %v5096_v5 = vpop.f32.mrb[32].mxu0 }
0x11a8   :  { %v5098_v31 = vpop.f32.mrb[33].mxu0 }
0x11ab   :  { %v5100_v6 = vpop.f32.mrb[22].mxu1  ;;  %v4151_v4 = vpop.f32.mrb[34].mxu0 }
0x11ac   :  { %v5102_v7 = vpop.f32.mrb[23].mxu1  ;;  %v2860_v8 = vpop.f32.mrb[35].mxu0  ;;  %v2878_v26 = vsel %vm106_vm1, %v4151_v4, -inf }
0x11ad   :  { %v2875_v25 = vsel %vm106_vm1, %v2860_v8, -inf }
0x11af   :  { %v4146_v13 = vpop.f32.mrb[24].mxu1 }
0x11b0   :  { %v2773_v17 = vpop.f32.mrb[25].mxu1  ;;  %v2872_v20 = vsel %vm106_vm1, %v4146_v13, -inf }
0x11b1   :  { %2873 = vmax.xlane.f32.xlu0 %v2872_v20  ;;  %v2869_v21 = vsel %vm106_vm1, %v2773_v17, -inf }
0x11b2   :  { %2870 = vmax.xlane.f32.xlu1 %v2869_v21 }
0x11b5   :  { %2876 = vmax.xlane.f32.xlu0 %v2875_v25 }
0x11b9   :  { %2879 = vmax.xlane.f32.xlu0 %v2878_v26 }
0x11c3   :  { %2913 = vrot.lane.b32.xlu1 %v5004_v27, %s4614_s14 }
0x11c7   :  { %3105 = vrot.lane.b32.xlu1 %v5004_v27, %s4615_s15 }
0x11cb   :  { %3101 = vrot.lane.b32.xlu1 %v4787_v18, %s4622_s0 }
0x11cf   :  { %3103 = vrot.lane.b32.xlu1 %v4785_v16, %s4622_s0  ;;  %2997 = vrot.lane.b32.xlu0 %v5002_v23, %s4614_s14 }
0x123e   :  { %v2874_v28 = vpop.xlane.xlu0 %2873 }
0x123f   :  { %v2871_v30 = vpop.xlane.xlu1 %2870  ;;  %v2882_v36 = vsub.f32 %v4146_v13, %v2874_v28 }
0x1240   :  { %v2881_v32 = vsub.f32 %v2773_v17, %v2871_v30 }
0x1241   :  { %v2887_v42 = vmul.f32 1.442695, %v2882_v36 }
0x1242   :  { %v2877_v33 = vpop.xlane.xlu0 %2876  ;;  %v2885_v37 = vmul.f32 1.442695, %v2881_v32 }
0x1243   :  { %v2883_v34 = vsub.f32 %v2860_v8, %v2877_v33  ;;  %v2914_v35 = vpop.permute.xlu1 %2913 }
0x1244   :  { %4152 = vmatprep.subr.mxu1 %v2914_v35 }
0x1245   :  { %v2889_v38 = vmul.f32 1.442695, %v2883_v34  ;;  %4153 = vmatpush3.msra.mxu1 %v2914_v35 }
0x1246   :  { %v2880_v39 = vpop.xlane.xlu0 %2879 }
0x1247   :  { %4443 = vpow2.f32 %v2889_v38  ;;  %v2884_v40 = vsub.f32 %v4151_v4, %v2880_v39  ;;  %v3106_v41 = vpop.permute.xlu1 %3105 }
0x1248   :  { %4162 = vmatprep.subr.msk.mxu1 %vm106_vm1, %v3106_v41  ;;  %4445 = vpow2.f32 %v2885_v37 }
0x1249   :  { %v2891_v43 = vmul.f32 1.442695, %v2884_v40 }
0x124a   :  { %v2998_v44 = vpop.permute.xlu0 %2997 }
0x124b   :  { %4447 = vpow2.f32 %v2891_v43  ;;  %4157 = vmatprep.subr.mxu0 %v2998_v44  ;;  %v3102_v12 = vpop.permute.xlu1 %3101 }
0x124c   :  { %4158 = vmatpush3.msra.mxu0 %v2998_v44  ;;  %4449 = vpow2.f32 %v2887_v42 }
0x124f   :  { %v3104_v53 = vpop.permute.xlu1 %3103 }
0x1251   :  { %v4444_v45 = vpop.eup %4443 }
0x1252   :  { %v2899_v46 = vsel %vm106_vm1, %v4444_v45, 0.0  ;;  %v4446_v47 = vpop.eup %4445 }
0x1253   :  { %2900 = vadd.xlane.f32.xlu1 %v2899_v46  ;;  %v2893_v50 = vsel %vm106_vm1, %v4446_v47, 0.0 }
0x1255   :  { %v4448_v48 = vpop.eup %4447 }
0x1256   :  { %v2902_v49 = vsel %vm106_vm1, %v4448_v48, 0.0  ;;  %v4450_v51 = vpop.eup %4449 }
0x1257   :  { %2903 = vadd.xlane.f32.xlu0 %v2902_v49  ;;  %2894 = vadd.xlane.f32.xlu1 %v2893_v50  ;;  %v2896_v52 = vsel %vm106_vm1, %v4450_v51, 0.0 }
0x125b   :  { %2897 = vadd.xlane.f32.xlu0 %v2896_v52 }
0x1268   :  { %3188 = vrot.lane.b32.xlu1 %v4799_v24, %s4622_s0 }
0x1271   :  { %3192 = vrot.lane.b32.xlu0 %v5002_v23, %s4615_s15 }
0x1275   :  { %3190 = vrot.lane.b32.xlu0 %v4797_v22, %s4622_s0 }
0x12e0   :  { %v2901_v54 = vpop.xlane.xlu1 %2900 }
0x12e1   :  { %4451 = vrcp.f32 %v2901_v54 }
0x12e4   :  { %v2904_v55 = vpop.xlane.xlu0 %2903  ;;  %v2895_v19 = vpop.xlane.xlu1 %2894 }
0x12e5   :  { %4453 = vrcp.f32 %v2904_v55 }
0x12e6   :  { %4455 = vrcp.f32 %v2895_v19 }
0x12e8   :  { %v2898_v56 = vpop.xlane.xlu0 %2897  ;;  %v3189_v61 = vpop.permute.xlu1 %3188 }
0x12e9   :  { %4457 = vrcp.f32 %v2898_v56 }
0x12eb   :  { %v4452_v0 = vpop.eup %4451 }
0x12ec   :  { %v3193_v14 = vpop.permute.xlu0 %3192  ;;  %v2911_v57 = vmul.f32 %v4452_v0, %v4444_v45 }
0x12ed   :  { %4167 = vmatprep.subr.msk.mxu0 %vm106_vm1, %v3193_v14 }
0x12ee   :  { %4159 = vmatprep.mubr.msk.f32.mxu0 %vm106_vm1, %v2911_v57 }
0x12ef   :  { %v4454_v58 = vpop.eup %4453 }
0x12f0   :  { %v4456_v1 = vpop.eup %4455  ;;  %v2912_v59 = vmul.f32 %v4454_v58, %v4448_v48  ;;  %v3191_v63 = vpop.permute.xlu0 %3190 }
0x12f1   :  { %v2909_v29 = vmul.f32 %v4456_v1, %v4446_v47 }
0x12f2   :  { %4160 = vmatmul.mubr.msk.f32.vlgmr.msra.gmra.mrb[36].mxu0 %vm106_vm1, %v2912_v59 }
0x12f3   :  { %v4458_v60 = vpop.eup %4457  ;;  %4154 = vmatprep.mubr.msk.f32.mxu1 %vm106_vm1, %v2909_v29  ;;  %4168 = vmatpush3.xpose.msk.msra.mxu0 %vm106_vm1, %v3193_v14 }
0x12f4   :  { %v2910_v62 = vmul.f32 %v4458_v60, %v4450_v51  ;;  %4169 = vmatprep.mubr.msk.f32.mxu0 %vm106_vm1, %v3189_v61 }
0x12f6   :  { %4155 = vmatmul.mubr.msk.f32.vlgmr.msra.gmra.mrb[26].mxu1 %vm106_vm1, %v2910_v62  ;;  %4170 = vmatmul.mubr.msk.f32.vlgmr.msra.gmra.mrb[38].mxu0 %vm106_vm1, %v3191_v63 }
0x12f7   :  { %4163 = vmatpush3.xpose.msk.msra.mxu1 %vm106_vm1, %v3106_v41  ;;  %4164 = vmatprep.mubr.msk.f32.mxu1 %vm106_vm1, %v3102_v12 }
0x12fa   :  { %4165 = vmatmul.mubr.msk.f32.vlgmr.msra.gmra.mrb[28].mxu1 %vm106_vm1, %v3104_v53 }
0x13c5   :  { %v4161_v2 = vpop.f32.mrb[36].mxu0 }
0x13c6   :  { %v3072_v3 = vpop.f32.mrb[37].mxu0 }
0x13c9   :  { %v4156_v4 = vpop.f32.mrb[26].mxu1  ;;  %v4171_v8 = vpop.f32.mrb[38].mxu0 }
0x13ca   :  { %v2988_v13 = vpop.f32.mrb[27].mxu1  ;;  %v3266_v17 = vpop.f32.mrb[39].mxu0  ;;  %v3284_v30 = vsel %vm106_vm1, %v4171_v8, -inf }
0x13cb   :  { %v3281_v28 = vsel %vm106_vm1, %v3266_v17, -inf }
0x13cd   :  { %v4166_v20 = vpop.f32.mrb[28].mxu1 }
0x13ce   :  { %v3179_v21 = vpop.f32.mrb[29].mxu1  ;;  %v3278_v25 = vsel %vm106_vm1, %v4166_v20, -inf }
0x13cf   :  { %3279 = vmax.xlane.f32.xlu0 %v3278_v25  ;;  %v3275_v26 = vsel %vm106_vm1, %v3179_v21, -inf }
0x13d0   :  { %3276 = vmax.xlane.f32.xlu1 %v3275_v26  ;;  %v1883_v26 = vld [vmem:[#allocation8 + $0x18] sm:$0xff] }
0x13d3   :  { %3282 = vmax.xlane.f32.xlu0 %v3281_v28 }
0x13d7   :  { %3285 = vmax.xlane.f32.xlu0 %v3284_v30 }
0x145c   :  { %v3280_v32 = vpop.xlane.xlu0 %3279 }
0x145d   :  { %v3277_v33 = vpop.xlane.xlu1 %3276  ;;  %v3288_v37 = vsub.f32 %v4166_v20, %v3280_v32  ;;  %v1882_v20 = vld [vmem:[#allocation8 + $0x10] sm:$0xff] }
0x145e   :  { %v3287_v34 = vsub.f32 %v3179_v21, %v3277_v33  ;;  %v4278_v32 = vpack.c.bf16 %v1883_v26, %v1882_v20 }
0x145f   :  { %v3293_v42 = vmul.f32 1.442695, %v3288_v37 }
0x1460   :  { %v3283_v35 = vpop.xlane.xlu0 %3282  ;;  %v3291_v38 = vmul.f32 1.442695, %v3287_v34 }
0x1461   :  { %v3289_v36 = vsub.f32 %v3266_v17, %v3283_v35  ;;  %v1881_v17 = vld [vmem:[#allocation8 + $0x8] sm:$0xff] }
0x1463   :  { %v3295_v39 = vmul.f32 1.442695, %v3289_v36 }
0x1464   :  { %v3286_v40 = vpop.xlane.xlu0 %3285 }
0x1465   :  { %4459 = vpow2.f32 %v3295_v39  ;;  %v3290_v41 = vsub.f32 %v4171_v8, %v3286_v40 }
0x1466   :  { %4461 = vpow2.f32 %v3291_v38 }
0x1467   :  { %v3297_v43 = vmul.f32 1.442695, %v3290_v41 }
0x1469   :  { %4463 = vpow2.f32 %v3297_v43 }
0x146a   :  { %4465 = vpow2.f32 %v3293_v42 }
0x146f   :  { %v4460_v44 = vpop.eup %4459 }
0x1470   :  { %v3305_v45 = vsel %vm106_vm1, %v4460_v44, 0.0  ;;  %v4462_v46 = vpop.eup %4461 }
0x1471   :  { %3306 = vadd.xlane.f32.xlu1 %v3305_v45  ;;  %v3299_v49 = vsel %vm106_vm1, %v4462_v46, 0.0 }
0x1473   :  { %v4464_v47 = vpop.eup %4463 }
0x1474   :  { %v3308_v48 = vsel %vm106_vm1, %v4464_v47, 0.0  ;;  %v4466_v50 = vpop.eup %4465 }
0x1475   :  { %3309 = vadd.xlane.f32.xlu0 %v3308_v48  ;;  %3300 = vadd.xlane.f32.xlu1 %v3299_v49  ;;  %v3302_v51 = vsel %vm106_vm1, %v4466_v50, 0.0 }
0x1479   :  { %3303 = vadd.xlane.f32.xlu0 %v3302_v51 }
0x1486   :  { %3319 = vrot.lane.b32.xlu1 %v5004_v27, %s4616_s10 }
0x148a   :  { %2273 = vrot.lane.b32.xlu1 %v5058_v15, %s4619_s22 }
0x148e   :  { %2679 = vrot.lane.b32.xlu1 %v5102_v7, %s4616_s10 }
0x148f   :  { %3403 = vrot.lane.b32.xlu0 %v5002_v23, %s4616_s10 }
0x1492   :  { %2275 = vrot.lane.b32.xlu1 %v5056_v11, %s4619_s22 }
0x1493   :  { %2681 = vrot.lane.b32.xlu0 %v5100_v6, %s4616_s10 }
0x1496   :  { %3085 = vrot.lane.b32.xlu1 %v2988_v13, %s4614_s14  ;;  %v1880_v13 = vld [vmem:[#allocation8] sm:$0xff] }
0x1497   :  { %3087 = vrot.lane.b32.xlu0 %v4156_v4, %s4614_s14  ;;  %v4274_v25 = vpack.c.bf16 %v1881_v17, %v1880_v13 }
0x149a   :  { %2277 = vrot.lane.b32.xlu1 %v5054_v10, %s4619_s22 }
0x149b   :  { %2683 = vrot.lane.b32.xlu0 %v5098_v31, %s4616_s10 }
0x149e   :  { %2279 = vrot.lane.b32.xlu1 %v5052_v9, %s4619_s22 }
0x149f   :  { %2685 = vrot.lane.b32.xlu0 %v5096_v5, %s4616_s10 }
0x14a2   :  { %3089 = vrot.lane.b32.xlu1 %v3072_v3, %s4614_s14 }
0x14a3   :  { %3091 = vrot.lane.b32.xlu0 %v4161_v2, %s4614_s14 }
0x14fe   :  { %v3307_v23 = vpop.xlane.xlu1 %3306 }
0x14ff   :  { %4467 = vrcp.f32 %v3307_v23 }
0x1502   :  { %v3310_v27 = vpop.xlane.xlu0 %3309  ;;  %v3301_v11 = vpop.xlane.xlu1 %3300 }
0x1503   :  { %4469 = vrcp.f32 %v3310_v27 }
0x1504   :  { %4471 = vrcp.f32 %v3301_v11 }
0x1506   :  { %v3304_v10 = vpop.xlane.xlu0 %3303  ;;  %v3320_v15 = vpop.permute.xlu1 %3319 }
0x1507   :  { %4473 = vrcp.f32 %v3304_v10  ;;  %4172 = vmatprep.subr.mxu1 %v3320_v15 }
0x1508   :  { %4173 = vmatpush3.msra.mxu1 %v3320_v15 }
0x1509   :  { %v4468_v31 = vpop.eup %4467  ;;  %4275 = vmatprep.subr.bf16.mxu1 %v4274_v25 }
0x150a   :  { %v3404_v9 = vpop.permute.xlu0 %3403  ;;  %v3317_v6 = vmul.f32 %v4468_v31, %v4460_v44  ;;  %v2274_v55 = vpop.permute.xlu1 %2273 }
0x150b   :  { %4177 = vmatprep.subr.mxu0 %v3404_v9  ;;  %v2285_v61 = vadd.f32 %v2274_v55, %v4787_v18 }
0x150c   :  { %4178 = vmatpush3.msra.mxu0 %v3404_v9  ;;  %4179 = vmatprep.mubr.msk.f32.mxu0 %vm106_vm1, %v3317_v6 }
0x150d   :  { %v4470_v5 = vpop.eup %4469 }
0x150e   :  { %v4472_v7 = vpop.eup %4471  ;;  %v3318_v52 = vmul.f32 %v4470_v5, %v4464_v47  ;;  %v2680_v19 = vpop.permute.xlu1 %2679 }
0x150f   :  { %v3315_v12 = vmul.f32 %v4472_v7, %v4462_v46  ;;  %v2682_v14 = vpop.permute.xlu0 %2681  ;;  %v2691_v29 = vadd.f32 %v2680_v19, %v4787_v18 }
0x1510   :  { %4180 = vmatmul.mubr.msk.f32.vlgmr.msra.gmra.mrb[40].mxu0 %vm106_vm1, %v3318_v52  ;;  %v2692_v62 = vadd.f32 %v2682_v14, %v4785_v16 }
0x1511   :  { %v4474_v53 = vpop.eup %4473  ;;  %4174 = vmatprep.mubr.msk.f32.mxu1 %vm106_vm1, %v3315_v12 }
0x1512   :  { %v3316_v54 = vmul.f32 %v4474_v53, %v4466_v50  ;;  %v2276_v58 = vpop.permute.xlu1 %2275 }
0x1513   :  { %v3088_v59 = vpop.permute.xlu0 %3087  ;;  %v2286_v63 = vadd.f32 %v2276_v58, %v4785_v16  ;;  %v3818_v58 = vld [vmem:[%s5261_s11] ss:$0 sm:$0xff]  ;;  %s4623_s11 = smov [#allocation10]  }
0x1514   :  { %4175 = vmatmul.mubr.msk.f32.vlgmr.msra.gmra.mrb[30].mxu1 %vm106_vm1, %v3316_v54  ;;  %v3098_v4 = vadd.f32 %v3088_v59, %v4785_v16  ;;  %s3719_s13 = sshll.u32 %s4623_s11, 4  ;;  %s3720_s13 = int_to_ptr.vmem [resolvable:$true] %s3719_s13 }
0x1515   :  { %4277 = vmatpush3.bf16.msra.mxu1 %v4274_v25  ;;  %s4571_s3 = scalar_lea.vmem %s3720_s13, 512  ;;  %p4576_p5 = scmp.lt.s32.totalorder %s3720_s13, %s3720_s13 }
0x1516   :  { %v3086_v60 = vpop.permute.xlu1 %3085  ;;  %4279 = vmatprep.subr.bf16.mxu1 %v4278_v32  ;;  %p4572_p4 = scmp.ne.s32.totalorder %s3720_s13, %s4571_s3  ;;  %p4577_p6 = scmp.lt.s32.totalorder %s4571_s3, %s4571_s3 }
0x1517   :  { %v2684_v2 = vpop.permute.xlu0 %2683  ;;  %v3097_v8 = vadd.f32 %v3086_v60, %v4787_v18 }
0x1518   :  { %v2693_v28 = vadd.f32 %v2684_v2, %v4799_v24  ;;  %p4578_p7 = por %p4577_p6, %p4576_p5 }
0x1519   :  { %4281 = vmatpush3.bf16.msra.mxu1 %v4278_v32 }
0x151a   :  { %v2278_v3 = vpop.permute.xlu1 %2277  ;;  %p4579_p8 = pnand %p4578_p7, %p4572_p4 }
0x151b   :  { %v2686_v21 = vpop.permute.xlu0 %2685  ;;  %v2287_v33 = vadd.f32 %v2278_v3, %v4799_v24 }
0x151c   :  { %v2694_v34 = vadd.f32 %v2686_v21, %v4797_v22 }
0x151e   :  { %v2280_v30 = vpop.permute.xlu1 %2279 }
0x151f   :  { %v3092_v35 = vpop.permute.xlu0 %3091  ;;  %v2288_v36 = vadd.f32 %v2280_v30, %v4797_v22 }
0x1520   :  { %v3100_v38 = vadd.f32 %v3092_v35, %v4797_v22 }
0x1522   :  { %v3090_v37 = vpop.permute.xlu1 %3089 }
0x1523   :  { %v3099_v39 = vadd.f32 %v3090_v37, %v4799_v24 }
0x15e3   :  { %v4181_v56 = vpop.f32.mrb[40].mxu0 }
0x15e4   :  { %v3478_v0 = vpop.f32.mrb[41].mxu0 }
0x15e7   :  { %v4176_v57 = vpop.f32.mrb[30].mxu1 }
0x15e8   :  { %3493 = vrot.lane.b32.xlu0 %v4176_v57, %s4612_s8  ;;  %v3394_v1 = vpop.f32.mrb[31].mxu1 }
0x15e9   :  { %3491 = vrot.lane.b32.xlu1 %v3394_v1, %s4612_s8 }
0x15ec   :  { %3497 = vrot.lane.b32.xlu0 %v4181_v56, %s4612_s8 }
0x15ed   :  { %3495 = vrot.lane.b32.xlu1 %v3478_v0, %s4612_s8 }
0x15f0   :  { %3527 = vrot.lane.b32.xlu0 %v2691_v29, %s4619_s22 }
0x15f1   :  { %3511 = vrot.lane.b32.xlu1 %v2285_v61, %s4619_s22 }
0x15f4   :  { %3529 = vrot.lane.b32.xlu0 %v2692_v62, %s4619_s22 }
0x15f5   :  { %3513 = vrot.lane.b32.xlu1 %v2286_v63, %s4619_s22 }
0x15f8   :  { %3545 = vrot.lane.b32.xlu0 %v3098_v4, %s4619_s22 }
0x15f9   :  { %3543 = vrot.lane.b32.xlu1 %v3097_v8, %s4619_s22 }
0x15fc   :  { %3531 = vrot.lane.b32.xlu0 %v2693_v28, %s4619_s22 }
0x15fd   :  { %3515 = vrot.lane.b32.xlu1 %v2287_v33, %s4619_s22 }
0x1600   :  { %3533 = vrot.lane.b32.xlu0 %v2694_v34, %s4619_s22 }
0x1601   :  { %3517 = vrot.lane.b32.xlu1 %v2288_v36, %s4619_s22 }
0x1604   :  { %3549 = vrot.lane.b32.xlu0 %v3100_v38, %s4619_s22 }
0x1605   :  { %3547 = vrot.lane.b32.xlu1 %v3099_v39, %s4619_s22 }
0x165a   :  { %v3494_v40 = vpop.permute.xlu0 %3493 }
0x165b   :  { %v3504_v41 = vadd.f32 %v3494_v40, %v4785_v16  ;;  %v3492_v42 = vpop.permute.xlu1 %3491 }
0x165c   :  { %v3503_v43 = vadd.f32 %v3492_v42, %v4787_v18 }
0x165d   :  { %3561 = vrot.lane.b32.xlu0 %v3504_v41, %s4619_s22 }
0x165e   :  { %v3498_v44 = vpop.permute.xlu0 %3497  ;;  %3559 = vrot.lane.b32.xlu1 %v3503_v43, %s4619_s22 }
0x165f   :  { %v3506_v45 = vadd.f32 %v3498_v44, %v4797_v22  ;;  %v3496_v46 = vpop.permute.xlu1 %3495 }
0x1660   :  { %v3505_v47 = vadd.f32 %v3496_v46, %v4799_v24 }
0x1661   :  { %3565 = vrot.lane.b32.xlu0 %v3506_v45, %s4619_s22 }
0x1662   :  { %3563 = vrot.lane.b32.xlu1 %v3505_v47, %s4619_s22  ;;  %v3528_v48 = vpop.permute.xlu0 %3527 }
0x1663   :  { %v3512_v49 = vpop.permute.xlu1 %3511 }
0x1664   :  { %v3571_v22 = vsel %vm106_vm1, %v3512_v49, %v3528_v48 }
0x1666   :  { %v3530_v16 = vpop.permute.xlu0 %3529 }
0x1667   :  { %v3514_v50 = vpop.permute.xlu1 %3513 }
0x1668   :  { %v3572_v24 = vsel %vm106_vm1, %v3514_v50, %v3530_v16 }
0x166a   :  { %v3546_v51 = vpop.permute.xlu0 %3545 }
0x166b   :  { %v3544_v18 = vpop.permute.xlu1 %3543  ;;  %v3576_v7 = vsel %vm449_vm4, %v3572_v24, %v3546_v51 }
0x166c   :  { %v3575_v6 = vsel %vm449_vm4, %v3571_v22, %v3544_v18 }
0x166e   :  { %v3532_v23 = vpop.permute.xlu0 %3531 }
0x166f   :  { %v3516_v27 = vpop.permute.xlu1 %3515 }
0x1670   :  { %v3573_v53 = vsel %vm106_vm1, %v3516_v27, %v3532_v23 }
0x1672   :  { %v3534_v11 = vpop.permute.xlu0 %3533 }
0x1673   :  { %v3518_v10 = vpop.permute.xlu1 %3517 }
0x1674   :  { %v3574_v55 = vsel %vm106_vm1, %v3518_v10, %v3534_v11 }
0x1676   :  { %v3550_v15 = vpop.permute.xlu0 %3549 }
0x1677   :  { %v3548_v31 = vpop.permute.xlu1 %3547  ;;  %v3578_v0 = vsel %vm449_vm4, %v3574_v55, %v3550_v15 }
0x1678   :  { %v3577_v19 = vsel %vm449_vm4, %v3573_v53, %v3548_v31 }
0x16cf   :  { %v3562_v9 = vpop.permute.xlu0 %3561 }
0x16d0   :  { %v3560_v5 = vpop.permute.xlu1 %3559  ;;  %v3580_v12 = vsel %vm1686_vm5, %v3576_v7, %v3562_v9 }
0x16d1   :  { %v3579_v52 = vsel %vm1686_vm5, %v3575_v6, %v3560_v5 }
0x16d2   :  { %4190 = vmatprep.mubr.msk.f32.mxu1 %vm215_vm2, %v3579_v52 }
0x16d3   :  { %v3566_v54 = vpop.permute.xlu0 %3565  ;;  %4191 = vmatmul.mubr.msk.f32.vlgmr.msra.gmra.mrb[32].mxu1 %vm215_vm2, %v3580_v12 }
0x16d4   :  { %v3564_v56 = vpop.permute.xlu1 %3563  ;;  %v3582_v57 = vsel %vm1686_vm5, %v3578_v0, %v3566_v54 }
0x16d5   :  { %v3581_v14 = vsel %vm1686_vm5, %v3577_v19, %v3564_v56 }
0x16d6   :  { %4193 = vmatprep.mubr.msk.f32.mxu1 %vm215_vm2, %v3581_v14 }
0x16d7   :  { %4194 = vmatmul.mubr.msk.f32.gmra.mrb[34].mxu1 %vm215_vm2, %v3582_v57 }
0x17a6   :  { %v4192_v1 = vpop.f32.mrb[32].mxu1 }
0x17a7   :  { %v3673_v59 = vadd.f32 %v4192_v1, %v3818_v58  ;;  %v3667_v29 = vpop.f32.mrb[33].mxu1 }
0x17a8   :  { %v3668_v60 = vadd.f32 %v3818_v58, %v3667_v29 }
0x17a9   :  { %v3691_v61 = vmul.f32 0.70710677, %v3673_v59  ;;  %v3687_v21 = vmul.f32 0.5, %v3673_v59 }
0x17aa   :  { %v3690_v62 = vmul.f32 0.70710677, %v3668_v60  ;;  %v4195_v63 = vpop.f32.mrb[34].mxu1  ;;  %v3686_v26 = vmul.f32 0.5, %v3668_v60 }
0x17ab   :  { %4475 = verf.f32 %v3691_v61  ;;  %v3683_v2 = vadd.f32 %v4195_v63, %v3818_v58  ;;  %v3677_v3 = vpop.f32.mrb[35].mxu1 }
0x17ac   :  { %4477 = verf.f32 %v3690_v62  ;;  %v3678_v4 = vadd.f32 %v3818_v58, %v3677_v3 }
0x17ad   :  { %v3693_v8 = vmul.f32 0.70710677, %v3683_v2  ;;  %v3689_v36 = vmul.f32 0.5, %v3683_v2 }
0x17ae   :  { %v3692_v13 = vmul.f32 0.70710677, %v3678_v4  ;;  %v3688_v39 = vmul.f32 0.5, %v3678_v4 }
0x17af   :  { %4479 = verf.f32 %v3693_v8 }
0x17b0   :  { %4481 = verf.f32 %v3692_v13 }
0x17b5   :  { %v4476_v17 = vpop.eup %4475 }
0x17b6   :  { %v4478_v20 = vpop.eup %4477  ;;  %v3699_v25 = vadd.f32 1.0, %v4476_v17 }
0x17b7   :  { %v3698_v28 = vadd.f32 1.0, %v4478_v20 }
0x17b8   :  { %v3703_v30 = vmul.f32 %v3699_v25, %v3687_v21 }
0x17b9   :  { %v4480_v32 = vpop.eup %4479  ;;  %v3702_v33 = vmul.f32 %v3698_v28, %v3686_v26 }
0x17ba   :  { %v4482_v34 = vpop.eup %4481  ;;  %v3707_v35 = vadd.f32 %v3703_v30, %v3580_v12  ;;  %v3701_v37 = vadd.f32 1.0, %v4480_v32 }
0x17bb   :  { %v3706_v38 = vadd.f32 %v3702_v33, %v3579_v52  ;;  %v3700_v40 = vadd.f32 1.0, %v4482_v34 }
0x17bc   :  { %3711 = vst.msk [vmem:[#allocation10 + $0x8] sm:$0xff] %vm215_vm2, %v3707_v35  ;;  %v3705_v41 = vmul.f32 %v3701_v37, %v3689_v36 }
0x17bd   :  { %3710 = vst.msk [vmem:[#allocation10] sm:$0xff] %vm215_vm2, %v3706_v38  ;;  %v3704_v42 = vmul.f32 %v3700_v40, %v3688_v39 }
0x17be   :  { %v3709_v43 = vadd.f32 %v3705_v41, %v3582_v57 }
0x17bf   :  { %v3708_v44 = vadd.f32 %v3704_v42, %v3581_v14 }
0x17c0   :  { %3713 = vst.msk [vmem:[#allocation10 + $0x18] sm:$0xff] %vm215_vm2, %v3709_v43 }
0x17c1   :  { %3712 = vst.msk [vmem:[#allocation10 + $0x10] sm:$0xff] %vm215_vm2, %v3708_v44 }
0x17c2   :  { %4582 = shalt.err (!%p4579_p8)
}
0x17c3   :  { %s4583_s14 = scalar_lea.hbm %s5262_s12, 512 }
0x17c4   :  { %p4584_p9 = scmp.ne.s32.totalorder %s5262_s12, %s4583_s14  ;;  %p4587_p10 = scmp.lt.u32.totalorder %s4583_s14, %s5262_s12 }
0x17c6   :  { %p4589_p11 = pnand %p4587_p10, %p4584_p9 }
0x17c8   :  { %4592 = shalt.err (!%p4589_p11)
}
0x17c9   :  { %3725 = dma.vmem_to_hbm [thread:$0]  %s3720_s13, 512, %s5262_s12, [#allocation4], %s4604_s1, %s4604_s1, %s4605_s24  }
0x17ca   :  { %4599 = dma.done.wait [#allocation4], 512  }
0x17cb   :  { %4600 = vsyncadd [#allocation4], 4294966784 }
0x17cc   :  { %3729 = vsyncpa [#allocation3], 1 }
0x17cd   :  { %3730 = vsyncpa [#allocation6], 1 }
0x17ce   :  { %3731 = vsyncpa [#allocation9], 1 }
0x17cf   :  { %3732 = vsyncpa [#allocation4], 1 }

</bundles_post_ra>
